<compile_context>
chip_gen: v7x
topology: tpu7x:2x2x1
jax: 0.10.0
libtpu: 0.0.40
codegen_flags: <defaults>
</compile_context>

<pallas_src>
import math

import jax
import jax.numpy as jnp
import numpy as np
from jax.experimental import pallas as pl
from jax.experimental.pallas import tpu as pltpu

HIDDEN_SIZES = [512, 256, 128, 64]  # module defaults
INPUT_SIZE = 32
BATCH = 8
DEFAULT_TB = 1024  # max batch tile; weights are ~0.9 MiB resident so VMEM is not the limit


def _round_up(n, m):
    return ((n + m - 1) // m) * m


# ----------------------------- in-kernel math helpers -----------------------------
def _gelu(x):
    # tanh-approximation GELU: 0.5*x*(1 + tanh(sqrt(2/pi)*(x + 0.044715*x^3)))
    # jnp.tanh lowers to the EUP (its own VLIW slot), so this is nearly free next to the VPU.
    # TODO(synk): torch.nn.GELU() default is exact (erf-based); Mosaic has no erf lowering,
    # so we use the tanh approximation (<1e-3 abs difference per activation).
    c = 0.7978845608028654  # sqrt(2/pi)
    return 0.5 * x * (1.0 + jnp.tanh(c * (x + 0.044715 * x * x * x)))


def _leaky_relu(x):
    # module uses nn.LeakyReLU(0.1) explicitly (not torch's 0.01 default)
    return jnp.where(x > 0.0, x, 0.1 * x)


# ----------------------------------- kernel ---------------------------------------
def _ultra_deep_kernel(x_ref, w0_ref, b0_ref, *rest):
    # rest = 3 residual blocks * (wsa, bsa, wb, bb) refs, then wo, bo, out_ref
    out_ref = rest[-1]
    wo_ref, bo_ref = rest[-3], rest[-2]
    block_refs = rest[:-3]

    # input_norm + input_projection Linear + BN (all folded) -> LeakyReLU(0.1); Dropout = id
    xb = x_ref[...].astype(jnp.bfloat16)
    h = jnp.dot(xb, w0_ref[...], preferred_element_type=jnp.float32) + b0_ref[...]
    h = _leaky_relu(h)

    # three residual blocks (512->256, 256->128, 128->64)
    for i in range(3):
        wsa, bsa, wb, bb = block_refs[4 * i:4 * i + 4]
        fout = wb.shape[1]
        # fused skip + main-path-first matmul: one (fin, 2*fout) weight, split the result
        z = jnp.dot(h.astype(jnp.bfloat16), wsa[...],
                    preferred_element_type=jnp.float32) + bsa[...]
        residual = z[:, :fout]                       # lane offset 0 -> no lane rotate
        if wb.shape[0] == 2 * fout:
            # fout < 128 (block 3): avoid the lane-misaligned z[:, fout:] slice.  GELU the
            # full 2*fout-wide z; wb's first fout rows are zero, so the residual half
            # contributes exactly 0 to the matmul.
            y = _gelu(z)
        else:
            y = _gelu(z[:, fout:])                   # tile-aligned split (fout = 256 / 128)
        y = jnp.dot(y.astype(jnp.bfloat16), wb[...],
                    preferred_element_type=jnp.float32) + bb[...]
        h = _gelu(y + residual)                      # block activation; Dropout = id

    # final Linear(64 -> 1) as a VPU/XLU reduction (avoids a wasted N=1 MXU pass)
    out_ref[...] = jnp.sum(h * wo_ref[...], axis=-1, keepdims=True) + bo_ref[...]


def ultra_deep_tabular(x, params, *, tb=DEFAULT_TB):
    b, f = x.shape
    # Clamp the tile for tiny serving batches (grid=(1,), 8-row tile).
    tb = min(tb, _round_up(b, 8))
    # Keep >= 2 grid steps for anything larger than a tiny batch so the "parallel" batch axis
    # can actually be sharded across both TensorCores on v7x.
    if b > 8:
        tb = min(tb, _round_up((b + 1) // 2, 8))
    bp = _round_up(b, tb)
    if bp != b:
        x = jnp.pad(x, ((0, bp - b), (0, 0)))

    flat = [x] + list(params)
    # Weights/biases get a constant index_map -> Pallas keeps them resident across grid steps;
    # only the x / out batch tiles are streamed.
    in_specs = [pl.BlockSpec((tb, f), lambda i: (i, 0))]
    in_specs += [pl.BlockSpec(p.shape, lambda i: (0, 0)) for p in params]

    # Advisory cost estimate for XLA scheduling around the custom call.
    macs_per_row = int(params[0].size + params[-2].size
                       + sum(params[2 + 4 * i].size + params[4 + 4 * i].size
                             for i in range(3)))
    tanh_per_row = int(sum(params[4 + 4 * i].shape[0] + params[4 + 4 * i].shape[1]
                           for i in range(3)))
    cost = pl.CostEstimate(
        flops=2 * macs_per_row * bp,
        transcendentals=tanh_per_row * bp,
        bytes_accessed=int(bp * (f * 4 + 4) + sum(int(p.nbytes) for p in params)))

    out = pl.pallas_call(
        _ultra_deep_kernel,
        out_shape=jax.ShapeDtypeStruct((bp, 1), jnp.float32),
        grid=(bp // tb,),
        in_specs=in_specs,
        out_specs=pl.BlockSpec((tb, 1), lambda i: (i, 0)),
        compiler_params=pltpu.CompilerParams(
            dimension_semantics=("parallel",),       # megacore shards the batch axis on v7x
            vmem_limit_bytes=32 * 1024 * 1024),      # v5e scoped-VMEM default is only 16 MiB
        cost_estimate=cost,
    )(*flat)
    return out[:b]


# --------------------------- parameter setup (plain-JAX glue) ---------------------------
def _kaiming_normal(key, in_size, out_size):
    # torch.nn.init.kaiming_normal_(W, mode='fan_in', nonlinearity='relu'); torch W is (out, in)
    std = math.sqrt(2.0 / in_size)
    return std * jax.random.normal(key, (out_size, in_size), dtype=jnp.float32)


def _bn_fold(gamma, beta, mean, var, eps=1e-5):
    scale = gamma / jnp.sqrt(var + eps)
    shift = beta - mean * scale
    return scale, shift


def _default_bn(n):
    # BatchNorm1d default params / running stats: gamma=1, beta=0, running_mean=0, running_var=1
    return _bn_fold(jnp.ones((n,), jnp.float32), jnp.zeros((n,), jnp.float32),
                    jnp.zeros((n,), jnp.float32), jnp.ones((n,), jnp.float32))


def _fold_linear(w, b, pre=None, post=None):
    # w: (out, in) torch layout.  Folds an optional preceding BN (pre) and following BN (post)
    # into the Linear.  Returns W' (in, out) and bias' (1, out), both float32.
    wt = w.T
    bias = b
    if pre is not None:
        s_in, t_in = pre
        bias = bias + t_in @ wt
        wt = s_in[:, None] * wt
    if post is not None:
        s_out, t_out = post
        wt = wt * s_out[None, :]
        bias = bias * s_out + t_out
    return wt.astype(jnp.float32), bias.reshape(1, -1).astype(jnp.float32)


def init_params(key, input_size, hidden_sizes=HIDDEN_SIZES):
    keys = iter(jax.random.split(key, 16))
    params = []

    # input_norm (BN on input) + input_projection Linear + BN  -> one folded (W, b)
    w0 = _kaiming_normal(next(keys), input_size, hidden_sizes[0])
    w0t, b0 = _fold_linear(w0, jnp.zeros((hidden_sizes[0],), jnp.float32),
                           pre=_default_bn(input_size), post=_default_bn(hidden_sizes[0]))
    params += [w0t.astype(jnp.bfloat16), b0]

    for i in range(len(hidden_sizes) - 1):
        fin, fout = hidden_sizes[i], hidden_sizes[i + 1]
        # skip path: Linear + BN (with the default hidden_sizes, in_size != out_size always,
        # so the nn.Identity() skip branch is never taken)
        ws = _kaiming_normal(next(keys), fin, fout)
        ws_t, bs = _fold_linear(ws, jnp.zeros((fout,), jnp.float32), post=_default_bn(fout))
        # main path first Linear + BN (folded)
        wa = _kaiming_normal(next(keys), fin, fout)
        wa_t, ba = _fold_linear(wa, jnp.zeros((fout,), jnp.float32), post=_default_bn(fout))
        # fuse skip + main-first matmul into one (fin, 2*fout) weight / (1, 2*fout) bias
        wsa = jnp.concatenate([ws_t, wa_t], axis=1)
        bsa = jnp.concatenate([bs, ba], axis=1)
        # main path second Linear + BN (folded)
        wb = _kaiming_normal(next(keys), fout, fout)
        wb_t, bb = _fold_linear(wb, jnp.zeros((fout,), jnp.float32), post=_default_bn(fout))
        if fout % 128 != 0:
            # Lane-misaligned split (fout=64): zero-pad wb's K dim so the kernel can GELU the
            # full 2*fout-wide z and skip the z[:, fout:] lane rotate.  Zero rows are exact.
            wb_t = jnp.concatenate([jnp.zeros((fout, fout), jnp.float32), wb_t], axis=0)
        params += [wsa.astype(jnp.bfloat16), bsa, wb_t.astype(jnp.bfloat16), bb]

    # output Linear(hidden_sizes[-1] -> 1): kept f32 as a (1, 64) row for the VPU reduction
    wo = _kaiming_normal(next(keys), hidden_sizes[-1], 1)
    wo_t, bo = _fold_linear(wo, jnp.zeros((1,), jnp.float32))
    params += [wo_t.reshape(1, -1), bo]
    return params


# ------------------------------ pure-JAX reference ------------------------------
def reference(x, params, quantize_activations=False):
    """Plain-JAX forward.  quantize_activations=True mirrors the kernel's bf16 operand cast
    at each matmul (weights are already stored in bf16 either way)."""
    hi = jax.lax.Precision.HIGHEST
    q = ((lambda v: v.astype(jnp.bfloat16).astype(jnp.float32))
         if quantize_activations else (lambda v: v))

    w0, b0 = params[0].astype(jnp.float32), params[1]
    h = jnp.dot(q(x), w0, precision=hi) + b0
    h = jnp.where(h > 0.0, h, 0.1 * h)
    for i in range(3):
        wsa, bsa, wb, bb = params[2 + 4 * i:2 + 4 * i + 4]
        fout = wb.shape[1]
        z = jnp.dot(q(h), wsa.astype(jnp.float32), precision=hi) + bsa
        res = z[:, :fout]
        if wb.shape[0] == 2 * fout:
            y = _gelu(z)               # padded wb rows are zero -> identical math
        else:
            y = _gelu(z[:, fout:])
        y = jnp.dot(q(y), wb.astype(jnp.float32), precision=hi) + bb
        h = _gelu(y + res)
    wo, bo = params[-2], params[-1]
    return jnp.sum(h * wo, axis=-1, keepdims=True) + bo


if __name__ == "__main__":
    key = jax.random.PRNGKey(0)
    kx, kp, kb = jax.random.split(key, 3)
    params = init_params(kp, INPUT_SIZE)

    # Tolerance note: in compiled Mosaic mode, in-kernel tanh runs on the EUP whose
    # approximation differs slightly from XLA's tanh; compounded across 6 GELU stages and
    # amplified by the matmuls this yields up to ~2e-2 output differences on rare rows
    # (observed max 1.6e-2), hence 5e-2 tolerances (3x margin).

    # --- small serving-style batch (grid=(1,), tile clamped to 8 rows) ---
    x_small = jax.random.normal(kx, (BATCH, INPUT_SIZE), dtype=jnp.float32)
    out_small = jax.block_until_ready(ultra_deep_tabular(x_small, params))
    assert out_small.shape == (BATCH, 1)
    np.testing.assert_allclose(np.asarray(out_small),
                               np.asarray(reference(x_small, params, True)),
                               rtol=5e-2, atol=5e-2)
    # looser sanity check vs the full-f32 reference (bf16 weight/activation quantization gap)
    np.testing.assert_allclose(np.asarray(out_small),
                               np.asarray(reference(x_small, params, False)),
                               rtol=1e-1, atol=1e-1)

    # --- larger batch exercising the tiled / megacore-parallel path (grid=(2,), padded) ---
    x_big = jax.random.normal(kb, (500, INPUT_SIZE), dtype=jnp.float32)
    out_big = jax.block_until_ready(ultra_deep_tabular(x_big, params))
    assert out_big.shape == (500, 1)
    np.testing.assert_allclose(np.asarray(out_big),
                               np.asarray(reference(x_big, params, True)),
                               rtol=5e-2, atol=5e-2)

    print("KERNEL_OK")
</pallas_src>

<mosaic_0001>
module attributes {stable_mosaic.version = 11 : i64} {
  func.func @_ultra_deep_kernel(%arg0: i32, %arg1: memref<8x32xf32, #tpu.memory_space<vmem>>, %arg2: memref<32x512xbf16, #tpu.memory_space<vmem>>, %arg3: memref<1x512xf32, #tpu.memory_space<vmem>>, %arg4: memref<512x512xbf16, #tpu.memory_space<vmem>>, %arg5: memref<1x512xf32, #tpu.memory_space<vmem>>, %arg6: memref<256x256xbf16, #tpu.memory_space<vmem>>, %arg7: memref<1x256xf32, #tpu.memory_space<vmem>>, %arg8: memref<256x256xbf16, #tpu.memory_space<vmem>>, %arg9: memref<1x256xf32, #tpu.memory_space<vmem>>, %arg10: memref<128x128xbf16, #tpu.memory_space<vmem>>, %arg11: memref<1x128xf32, #tpu.memory_space<vmem>>, %arg12: memref<128x128xbf16, #tpu.memory_space<vmem>>, %arg13: memref<1x128xf32, #tpu.memory_space<vmem>>, %arg14: memref<128x64xbf16, #tpu.memory_space<vmem>>, %arg15: memref<1x64xf32, #tpu.memory_space<vmem>>, %arg16: memref<1x64xf32, #tpu.memory_space<vmem>>, %arg17: memref<1x1xf32, #tpu.memory_space<vmem>>, %arg18: memref<8x1xf32, #tpu.memory_space<vmem>>) attributes {dimension_semantics = [#tpu.dimension_semantics<parallel>], iteration_bounds = array<i64: 1>, scalar_prefetch = 0 : i64, scratch_operands = 0 : i64, tpu.core_type = #tpu.core_type<tc>, window_params = [{transform_indices = @transform_0, window_bounds = array<i64: 8, 32>}, {pipeline_mode = #tpu.pipeline_mode<synchronous>, transform_indices = @transform_1, window_bounds = array<i64: 32, 512>}, {pipeline_mode = #tpu.pipeline_mode<synchronous>, transform_indices = @transform_2, window_bounds = array<i64: 1, 512>}, {pipeline_mode = #tpu.pipeline_mode<synchronous>, transform_indices = @transform_3, window_bounds = array<i64: 512, 512>}, {pipeline_mode = #tpu.pipeline_mode<synchronous>, transform_indices = @transform_4, window_bounds = array<i64: 1, 512>}, {pipeline_mode = #tpu.pipeline_mode<synchronous>, transform_indices = @transform_5, window_bounds = array<i64: 256, 256>}, {pipeline_mode = #tpu.pipeline_mode<synchronous>, transform_indices = @transform_6, window_bounds = array<i64: 1, 256>}, {pipeline_mode = #tpu.pipeline_mode<synchronous>, transform_indices = @transform_7, window_bounds = array<i64: 256, 256>}, {pipeline_mode = #tpu.pipeline_mode<synchronous>, transform_indices = @transform_8, window_bounds = array<i64: 1, 256>}, {pipeline_mode = #tpu.pipeline_mode<synchronous>, transform_indices = @transform_9, window_bounds = array<i64: 128, 128>}, {pipeline_mode = #tpu.pipeline_mode<synchronous>, transform_indices = @transform_10, window_bounds = array<i64: 1, 128>}, {pipeline_mode = #tpu.pipeline_mode<synchronous>, transform_indices = @transform_11, window_bounds = array<i64: 128, 128>}, {pipeline_mode = #tpu.pipeline_mode<synchronous>, transform_indices = @transform_12, window_bounds = array<i64: 1, 128>}, {pipeline_mode = #tpu.pipeline_mode<synchronous>, transform_indices = @transform_13, window_bounds = array<i64: 128, 64>}, {pipeline_mode = #tpu.pipeline_mode<synchronous>, transform_indices = @transform_14, window_bounds = array<i64: 1, 64>}, {pipeline_mode = #tpu.pipeline_mode<synchronous>, transform_indices = @transform_15, window_bounds = array<i64: 1, 64>}, {pipeline_mode = #tpu.pipeline_mode<synchronous>, transform_indices = @transform_16, window_bounds = array<i64: 1, 1>}, {transform_indices = @transform_17, window_bounds = array<i64: 8, 1>}]} {
    %c0 = arith.constant 0 : index
    %c0_0 = arith.constant 0 : index
    %0 = vector.load %arg1[%c0, %c0_0] : memref<8x32xf32, #tpu.memory_space<vmem>>, vector<8x32xf32>
    %1 = arith.truncf %0 : vector<8x32xf32> to vector<8x32xbf16>
    %c0_1 = arith.constant 0 : index
    %c0_2 = arith.constant 0 : index
    %2 = vector.load %arg2[%c0_1, %c0_2] : memref<32x512xbf16, #tpu.memory_space<vmem>>, vector<32x512xbf16>
    %cst = arith.constant dense<0.000000e+00> : vector<8x512xf32>
    %3 = tpu.matmul %1, %2, %cst {dimension_numbers = #tpu.dot_dimension_numbers<[1], [0], [0], [1], [0, 0, 1, 1], [], []>} : vector<8x32xbf16>, vector<32x512xbf16>, vector<8x512xf32> -> vector<8x512xf32>
    %c0_3 = arith.constant 0 : index
    %c0_4 = arith.constant 0 : index
    %4 = vector.load %arg3[%c0_3, %c0_4] : memref<1x512xf32, #tpu.memory_space<vmem>>, vector<1x512xf32>
    %5 = vector.broadcast %4 : vector<1x512xf32> to vector<8x512xf32>
    %6 = arith.addf %3, %5 : vector<8x512xf32>
    %cst_5 = arith.constant 0.000000e+00 : f32
    %7 = vector.broadcast %cst_5 : f32 to vector<8x512xf32>
    %8 = arith.cmpf ogt, %6, %7 : vector<8x512xf32>
    %cst_6 = arith.constant 1.000000e-01 : f32
    %9 = vector.broadcast %cst_6 : f32 to vector<8x512xf32>
    %10 = arith.mulf %9, %6 : vector<8x512xf32>
    %11 = arith.select %8, %6, %10 : vector<8x512xi1>, vector<8x512xf32>
    %12 = arith.truncf %11 : vector<8x512xf32> to vector<8x512xbf16>
    %c0_7 = arith.constant 0 : index
    %c0_8 = arith.constant 0 : index
    %13 = vector.load %arg4[%c0_7, %c0_8] : memref<512x512xbf16, #tpu.memory_space<vmem>>, vector<512x512xbf16>
    %cst_9 = arith.constant dense<0.000000e+00> : vector<8x512xf32>
    %14 = tpu.matmul %12, %13, %cst_9 {dimension_numbers = #tpu.dot_dimension_numbers<[1], [0], [0], [1], [0, 0, 1, 1], [], []>} : vector<8x512xbf16>, vector<512x512xbf16>, vector<8x512xf32> -> vector<8x512xf32>
    %c0_10 = arith.constant 0 : index
    %c0_11 = arith.constant 0 : index
    %15 = vector.load %arg5[%c0_10, %c0_11] : memref<1x512xf32, #tpu.memory_space<vmem>>, vector<1x512xf32>
    %16 = vector.broadcast %15 : vector<1x512xf32> to vector<8x512xf32>
    %17 = arith.addf %14, %16 : vector<8x512xf32>
    %18 = vector.extract_strided_slice %17 {offsets = [0, 0], sizes = [8, 256], strides = [1, 1]} : vector<8x512xf32> to vector<8x256xf32>
    %19 = vector.extract_strided_slice %17 {offsets = [0, 256], sizes = [8, 256], strides = [1, 1]} : vector<8x512xf32> to vector<8x256xf32>
    %cst_12 = arith.constant 5.000000e-01 : f32
    %20 = vector.broadcast %cst_12 : f32 to vector<8x256xf32>
    %21 = arith.mulf %20, %19 : vector<8x256xf32>
    %cst_13 = arith.constant 4.471500e-02 : f32
    %22 = vector.broadcast %cst_13 : f32 to vector<8x256xf32>
    %23 = arith.mulf %22, %19 : vector<8x256xf32>
    %24 = arith.mulf %23, %19 : vector<8x256xf32>
    %25 = arith.mulf %24, %19 : vector<8x256xf32>
    %26 = arith.addf %19, %25 : vector<8x256xf32>
    %cst_14 = arith.constant 0.797884583 : f32
    %27 = vector.broadcast %cst_14 : f32 to vector<8x256xf32>
    %28 = arith.mulf %27, %26 : vector<8x256xf32>
    %29 = math.tanh %28 : vector<8x256xf32>
    %cst_15 = arith.constant 1.000000e+00 : f32
    %30 = vector.broadcast %cst_15 : f32 to vector<8x256xf32>
    %31 = arith.addf %30, %29 : vector<8x256xf32>
    %32 = arith.mulf %21, %31 : vector<8x256xf32>
    %33 = arith.truncf %32 : vector<8x256xf32> to vector<8x256xbf16>
    %c0_16 = arith.constant 0 : index
    %c0_17 = arith.constant 0 : index
    %34 = vector.load %arg6[%c0_16, %c0_17] : memref<256x256xbf16, #tpu.memory_space<vmem>>, vector<256x256xbf16>
    %cst_18 = arith.constant dense<0.000000e+00> : vector<8x256xf32>
    %35 = tpu.matmul %33, %34, %cst_18 {dimension_numbers = #tpu.dot_dimension_numbers<[1], [0], [0], [1], [0, 0, 1, 1], [], []>} : vector<8x256xbf16>, vector<256x256xbf16>, vector<8x256xf32> -> vector<8x256xf32>
    %c0_19 = arith.constant 0 : index
    %c0_20 = arith.constant 0 : index
    %36 = vector.load %arg7[%c0_19, %c0_20] : memref<1x256xf32, #tpu.memory_space<vmem>>, vector<1x256xf32>
    %37 = vector.broadcast %36 : vector<1x256xf32> to vector<8x256xf32>
    %38 = arith.addf %35, %37 : vector<8x256xf32>
    %39 = arith.addf %38, %18 : vector<8x256xf32>
    %cst_21 = arith.constant 5.000000e-01 : f32
    %40 = vector.broadcast %cst_21 : f32 to vector<8x256xf32>
    %41 = arith.mulf %40, %39 : vector<8x256xf32>
    %cst_22 = arith.constant 4.471500e-02 : f32
    %42 = vector.broadcast %cst_22 : f32 to vector<8x256xf32>
    %43 = arith.mulf %42, %39 : vector<8x256xf32>
    %44 = arith.mulf %43, %39 : vector<8x256xf32>
    %45 = arith.mulf %44, %39 : vector<8x256xf32>
    %46 = arith.addf %39, %45 : vector<8x256xf32>
    %cst_23 = arith.constant 0.797884583 : f32
    %47 = vector.broadcast %cst_23 : f32 to vector<8x256xf32>
    %48 = arith.mulf %47, %46 : vector<8x256xf32>
    %49 = math.tanh %48 : vector<8x256xf32>
    %cst_24 = arith.constant 1.000000e+00 : f32
    %50 = vector.broadcast %cst_24 : f32 to vector<8x256xf32>
    %51 = arith.addf %50, %49 : vector<8x256xf32>
    %52 = arith.mulf %41, %51 : vector<8x256xf32>
    %53 = arith.truncf %52 : vector<8x256xf32> to vector<8x256xbf16>
    %c0_25 = arith.constant 0 : index
    %c0_26 = arith.constant 0 : index
    %54 = vector.load %arg8[%c0_25, %c0_26] : memref<256x256xbf16, #tpu.memory_space<vmem>>, vector<256x256xbf16>
    %cst_27 = arith.constant dense<0.000000e+00> : vector<8x256xf32>
    %55 = tpu.matmul %53, %54, %cst_27 {dimension_numbers = #tpu.dot_dimension_numbers<[1], [0], [0], [1], [0, 0, 1, 1], [], []>} : vector<8x256xbf16>, vector<256x256xbf16>, vector<8x256xf32> -> vector<8x256xf32>
    %c0_28 = arith.constant 0 : index
    %c0_29 = arith.constant 0 : index
    %56 = vector.load %arg9[%c0_28, %c0_29] : memref<1x256xf32, #tpu.memory_space<vmem>>, vector<1x256xf32>
    %57 = vector.broadcast %56 : vector<1x256xf32> to vector<8x256xf32>
    %58 = arith.addf %55, %57 : vector<8x256xf32>
    %59 = vector.extract_strided_slice %58 {offsets = [0, 0], sizes = [8, 128], strides = [1, 1]} : vector<8x256xf32> to vector<8x128xf32>
    %60 = vector.extract_strided_slice %58 {offsets = [0, 128], sizes = [8, 128], strides = [1, 1]} : vector<8x256xf32> to vector<8x128xf32>
    %cst_30 = arith.constant 5.000000e-01 : f32
    %61 = vector.broadcast %cst_30 : f32 to vector<8x128xf32>
    %62 = arith.mulf %61, %60 : vector<8x128xf32>
    %cst_31 = arith.constant 4.471500e-02 : f32
    %63 = vector.broadcast %cst_31 : f32 to vector<8x128xf32>
    %64 = arith.mulf %63, %60 : vector<8x128xf32>
    %65 = arith.mulf %64, %60 : vector<8x128xf32>
    %66 = arith.mulf %65, %60 : vector<8x128xf32>
    %67 = arith.addf %60, %66 : vector<8x128xf32>
    %cst_32 = arith.constant 0.797884583 : f32
    %68 = vector.broadcast %cst_32 : f32 to vector<8x128xf32>
    %69 = arith.mulf %68, %67 : vector<8x128xf32>
    %70 = math.tanh %69 : vector<8x128xf32>
    %cst_33 = arith.constant 1.000000e+00 : f32
    %71 = vector.broadcast %cst_33 : f32 to vector<8x128xf32>
    %72 = arith.addf %71, %70 : vector<8x128xf32>
    %73 = arith.mulf %62, %72 : vector<8x128xf32>
    %74 = arith.truncf %73 : vector<8x128xf32> to vector<8x128xbf16>
    %c0_34 = arith.constant 0 : index
    %c0_35 = arith.constant 0 : index
    %75 = vector.load %arg10[%c0_34, %c0_35] : memref<128x128xbf16, #tpu.memory_space<vmem>>, vector<128x128xbf16>
    %cst_36 = arith.constant dense<0.000000e+00> : vector<8x128xf32>
    %76 = tpu.matmul %74, %75, %cst_36 {dimension_numbers = #tpu.dot_dimension_numbers<[1], [0], [0], [1], [0, 0, 1, 1], [], []>} : vector<8x128xbf16>, vector<128x128xbf16>, vector<8x128xf32> -> vector<8x128xf32>
    %c0_37 = arith.constant 0 : index
    %c0_38 = arith.constant 0 : index
    %77 = vector.load %arg11[%c0_37, %c0_38] : memref<1x128xf32, #tpu.memory_space<vmem>>, vector<1x128xf32>
    %78 = vector.broadcast %77 : vector<1x128xf32> to vector<8x128xf32>
    %79 = arith.addf %76, %78 : vector<8x128xf32>
    %80 = arith.addf %79, %59 : vector<8x128xf32>
    %cst_39 = arith.constant 5.000000e-01 : f32
    %81 = vector.broadcast %cst_39 : f32 to vector<8x128xf32>
    %82 = arith.mulf %81, %80 : vector<8x128xf32>
    %cst_40 = arith.constant 4.471500e-02 : f32
    %83 = vector.broadcast %cst_40 : f32 to vector<8x128xf32>
    %84 = arith.mulf %83, %80 : vector<8x128xf32>
    %85 = arith.mulf %84, %80 : vector<8x128xf32>
    %86 = arith.mulf %85, %80 : vector<8x128xf32>
    %87 = arith.addf %80, %86 : vector<8x128xf32>
    %cst_41 = arith.constant 0.797884583 : f32
    %88 = vector.broadcast %cst_41 : f32 to vector<8x128xf32>
    %89 = arith.mulf %88, %87 : vector<8x128xf32>
    %90 = math.tanh %89 : vector<8x128xf32>
    %cst_42 = arith.constant 1.000000e+00 : f32
    %91 = vector.broadcast %cst_42 : f32 to vector<8x128xf32>
    %92 = arith.addf %91, %90 : vector<8x128xf32>
    %93 = arith.mulf %82, %92 : vector<8x128xf32>
    %94 = arith.truncf %93 : vector<8x128xf32> to vector<8x128xbf16>
    %c0_43 = arith.constant 0 : index
    %c0_44 = arith.constant 0 : index
    %95 = vector.load %arg12[%c0_43, %c0_44] : memref<128x128xbf16, #tpu.memory_space<vmem>>, vector<128x128xbf16>
    %cst_45 = arith.constant dense<0.000000e+00> : vector<8x128xf32>
    %96 = tpu.matmul %94, %95, %cst_45 {dimension_numbers = #tpu.dot_dimension_numbers<[1], [0], [0], [1], [0, 0, 1, 1], [], []>} : vector<8x128xbf16>, vector<128x128xbf16>, vector<8x128xf32> -> vector<8x128xf32>
    %c0_46 = arith.constant 0 : index
    %c0_47 = arith.constant 0 : index
    %97 = vector.load %arg13[%c0_46, %c0_47] : memref<1x128xf32, #tpu.memory_space<vmem>>, vector<1x128xf32>
    %98 = vector.broadcast %97 : vector<1x128xf32> to vector<8x128xf32>
    %99 = arith.addf %96, %98 : vector<8x128xf32>
    %100 = vector.extract_strided_slice %99 {offsets = [0, 0], sizes = [8, 64], strides = [1, 1]} : vector<8x128xf32> to vector<8x64xf32>
    %cst_48 = arith.constant 5.000000e-01 : f32
    %101 = vector.broadcast %cst_48 : f32 to vector<8x128xf32>
    %102 = arith.mulf %101, %99 : vector<8x128xf32>
    %cst_49 = arith.constant 4.471500e-02 : f32
    %103 = vector.broadcast %cst_49 : f32 to vector<8x128xf32>
    %104 = arith.mulf %103, %99 : vector<8x128xf32>
    %105 = arith.mulf %104, %99 : vector<8x128xf32>
    %106 = arith.mulf %105, %99 : vector<8x128xf32>
    %107 = arith.addf %99, %106 : vector<8x128xf32>
    %cst_50 = arith.constant 0.797884583 : f32
    %108 = vector.broadcast %cst_50 : f32 to vector<8x128xf32>
    %109 = arith.mulf %108, %107 : vector<8x128xf32>
    %110 = math.tanh %109 : vector<8x128xf32>
    %cst_51 = arith.constant 1.000000e+00 : f32
    %111 = vector.broadcast %cst_51 : f32 to vector<8x128xf32>
    %112 = arith.addf %111, %110 : vector<8x128xf32>
    %113 = arith.mulf %102, %112 : vector<8x128xf32>
    %114 = arith.truncf %113 : vector<8x128xf32> to vector<8x128xbf16>
    %c0_52 = arith.constant 0 : index
    %c0_53 = arith.constant 0 : index
    %115 = vector.load %arg14[%c0_52, %c0_53] : memref<128x64xbf16, #tpu.memory_space<vmem>>, vector<128x64xbf16>
    %cst_54 = arith.constant dense<0.000000e+00> : vector<8x64xf32>
    %116 = tpu.matmul %114, %115, %cst_54 {dimension_numbers = #tpu.dot_dimension_numbers<[1], [0], [0], [1], [0, 0, 1, 1], [], []>} : vector<8x128xbf16>, vector<128x64xbf16>, vector<8x64xf32> -> vector<8x64xf32>
    %c0_55 = arith.constant 0 : index
    %c0_56 = arith.constant 0 : index
    %117 = vector.load %arg15[%c0_55, %c0_56] : memref<1x64xf32, #tpu.memory_space<vmem>>, vector<1x64xf32>
    %118 = vector.broadcast %117 : vector<1x64xf32> to vector<8x64xf32>
    %119 = arith.addf %116, %118 : vector<8x64xf32>
    %120 = arith.addf %119, %100 : vector<8x64xf32>
    %cst_57 = arith.constant 5.000000e-01 : f32
    %121 = vector.broadcast %cst_57 : f32 to vector<8x64xf32>
    %122 = arith.mulf %121, %120 : vector<8x64xf32>
    %cst_58 = arith.constant 4.471500e-02 : f32
    %123 = vector.broadcast %cst_58 : f32 to vector<8x64xf32>
    %124 = arith.mulf %123, %120 : vector<8x64xf32>
    %125 = arith.mulf %124, %120 : vector<8x64xf32>
    %126 = arith.mulf %125, %120 : vector<8x64xf32>
    %127 = arith.addf %120, %126 : vector<8x64xf32>
    %cst_59 = arith.constant 0.797884583 : f32
    %128 = vector.broadcast %cst_59 : f32 to vector<8x64xf32>
    %129 = arith.mulf %128, %127 : vector<8x64xf32>
    %130 = math.tanh %129 : vector<8x64xf32>
    %cst_60 = arith.constant 1.000000e+00 : f32
    %131 = vector.broadcast %cst_60 : f32 to vector<8x64xf32>
    %132 = arith.addf %131, %130 : vector<8x64xf32>
    %133 = arith.mulf %122, %132 : vector<8x64xf32>
    %c0_61 = arith.constant 0 : index
    %c0_62 = arith.constant 0 : index
    %134 = vector.load %arg16[%c0_61, %c0_62] : memref<1x64xf32, #tpu.memory_space<vmem>>, vector<1x64xf32>
    %135 = vector.broadcast %134 : vector<1x64xf32> to vector<8x64xf32>
    %136 = arith.mulf %133, %135 : vector<8x64xf32>
    %cst_63 = arith.constant dense<0.000000e+00> : vector<8xf32>
    %137 = vector.multi_reduction <add>, %136, %cst_63 [1] : vector<8x64xf32> to vector<8xf32>
    %138 = vector.shape_cast %137 : vector<8xf32> to vector<8x1xf32>
    %c0_64 = arith.constant 0 : index
    %c0_65 = arith.constant 0 : index
    %139 = vector.load %arg17[%c0_64, %c0_65] : memref<1x1xf32, #tpu.memory_space<vmem>>, vector<1x1xf32>
    %140 = vector.broadcast %139 : vector<1x1xf32> to vector<8x1xf32>
    %141 = arith.addf %138, %140 : vector<8x1xf32>
    %c0_66 = arith.constant 0 : index
    %c0_67 = arith.constant 0 : index
    %142 = vector.load %arg18[%c0_66, %c0_67] : memref<8x1xf32, #tpu.memory_space<vmem>>, vector<8x1xf32>
    tpu.vector_store %arg18[%c0_66, %c0_67], %141 {strides = array<i32>} : memref<8x1xf32, #tpu.memory_space<vmem>>, vector<8x1xf32>,
    return
  }
  func.func @transform_0(%arg0: i32) -> (i32, i32) {
    %c0_i32 = arith.constant 0 : i32
    %c0_i32_0 = arith.constant 0 : i32
    return %arg0, %c0_i32 : i32, i32
  }
  func.func @transform_1(%arg0: i32) -> (i32, i32) {
    %c0_i32 = arith.constant 0 : i32
    %c0_i32_0 = arith.constant 0 : i32
    %c0_i32_1 = arith.constant 0 : i32
    return %c0_i32, %c0_i32_0 : i32, i32
  }
  func.func @transform_2(%arg0: i32) -> (i32, i32) {
    %c0_i32 = arith.constant 0 : i32
    %c0_i32_0 = arith.constant 0 : i32
    %c0_i32_1 = arith.constant 0 : i32
    return %c0_i32, %c0_i32_0 : i32, i32
  }
  func.func @transform_3(%arg0: i32) -> (i32, i32) {
    %c0_i32 = arith.constant 0 : i32
    %c0_i32_0 = arith.constant 0 : i32
    %c0_i32_1 = arith.constant 0 : i32
    return %c0_i32, %c0_i32_0 : i32, i32
  }
  func.func @transform_4(%arg0: i32) -> (i32, i32) {
    %c0_i32 = arith.constant 0 : i32
    %c0_i32_0 = arith.constant 0 : i32
    %c0_i32_1 = arith.constant 0 : i32
    return %c0_i32, %c0_i32_0 : i32, i32
  }
  func.func @transform_5(%arg0: i32) -> (i32, i32) {
    %c0_i32 = arith.constant 0 : i32
    %c0_i32_0 = arith.constant 0 : i32
    %c0_i32_1 = arith.constant 0 : i32
    return %c0_i32, %c0_i32_0 : i32, i32
  }
  func.func @transform_6(%arg0: i32) -> (i32, i32) {
    %c0_i32 = arith.constant 0 : i32
    %c0_i32_0 = arith.constant 0 : i32
    %c0_i32_1 = arith.constant 0 : i32
    return %c0_i32, %c0_i32_0 : i32, i32
  }
  func.func @transform_7(%arg0: i32) -> (i32, i32) {
    %c0_i32 = arith.constant 0 : i32
    %c0_i32_0 = arith.constant 0 : i32
    %c0_i32_1 = arith.constant 0 : i32
    return %c0_i32, %c0_i32_0 : i32, i32
  }
  func.func @transform_8(%arg0: i32) -> (i32, i32) {
    %c0_i32 = arith.constant 0 : i32
    %c0_i32_0 = arith.constant 0 : i32
    %c0_i32_1 = arith.constant 0 : i32
    return %c0_i32, %c0_i32_0 : i32, i32
  }
  func.func @transform_9(%arg0: i32) -> (i32, i32) {
    %c0_i32 = arith.constant 0 : i32
    %c0_i32_0 = arith.constant 0 : i32
    %c0_i32_1 = arith.constant 0 : i32
    return %c0_i32, %c0_i32_0 : i32, i32
  }
  func.func @transform_10(%arg0: i32) -> (i32, i32) {
    %c0_i32 = arith.constant 0 : i32
    %c0_i32_0 = arith.constant 0 : i32
    %c0_i32_1 = arith.constant 0 : i32
    return %c0_i32, %c0_i32_0 : i32, i32
  }
  func.func @transform_11(%arg0: i32) -> (i32, i32) {
    %c0_i32 = arith.constant 0 : i32
    %c0_i32_0 = arith.constant 0 : i32
    %c0_i32_1 = arith.constant 0 : i32
    return %c0_i32, %c0_i32_0 : i32, i32
  }
  func.func @transform_12(%arg0: i32) -> (i32, i32) {
    %c0_i32 = arith.constant 0 : i32
    %c0_i32_0 = arith.constant 0 : i32
    %c0_i32_1 = arith.constant 0 : i32
    return %c0_i32, %c0_i32_0 : i32, i32
  }
  func.func @transform_13(%arg0: i32) -> (i32, i32) {
    %c0_i32 = arith.constant 0 : i32
    %c0_i32_0 = arith.constant 0 : i32
    %c0_i32_1 = arith.constant 0 : i32
    return %c0_i32, %c0_i32_0 : i32, i32
  }
  func.func @transform_14(%arg0: i32) -> (i32, i32) {
    %c0_i32 = arith.constant 0 : i32
    %c0_i32_0 = arith.constant 0 : i32
    %c0_i32_1 = arith.constant 0 : i32
    return %c0_i32, %c0_i32_0 : i32, i32
  }
  func.func @transform_15(%arg0: i32) -> (i32, i32) {
    %c0_i32 = arith.constant 0 : i32
    %c0_i32_0 = arith.constant 0 : i32
    %c0_i32_1 = arith.constant 0 : i32
    return %c0_i32, %c0_i32_0 : i32, i32
  }
  func.func @transform_16(%arg0: i32) -> (i32, i32) {
    %c0_i32 = arith.constant 0 : i32
    %c0_i32_0 = arith.constant 0 : i32
    %c0_i32_1 = arith.constant 0 : i32
    return %c0_i32, %c0_i32_0 : i32, i32
  }
  func.func @transform_17(%arg0: i32) -> (i32, i32) {
    %c0_i32 = arith.constant 0 : i32
    %c0_i32_0 = arith.constant 0 : i32
    return %arg0, %c0_i32 : i32, i32
  }
}

</mosaic_0001>

<bundles_post_ra>
// kernel: tpu_custom_call.1
= control target key start
LH: loop header
LB: loop body
LE: loop exit
PB: predicated region body
PF: predicated region fallthrough
CT: control target
= control target key end

     0   :  { %s3479_s0 = inlined_call_operand.hbm [shape: f32[8,32], index: 0, kind: input, shape index: {}]   ;;  %s3480_s1 = inlined_call_operand.vmem [shape: bf16[32,512], index: 1, kind: input, shape index: {}]   ;;  %s3481_s2 = inlined_call_operand.hbm [shape: f32[1,512], index: 2, kind: input, shape index: {}]   ;;  %s3482_s3 = inlined_call_operand.hbm [shape: bf16[512,512], index: 3, kind: input, shape index: {}]   ;;  %s3483_s4 = inlined_call_operand.hbm [shape: f32[1,512], index: 4, kind: input, shape index: {}]   ;;  %s3484_s5 = inlined_call_operand.hbm [shape: bf16[256,256], index: 5, kind: input, shape index: {}]   ;;  %s3485_s6 = inlined_call_operand.vmem [shape: f32[1,256], index: 6, kind: input, shape index: {}]   ;;  %s3486_s7 = inlined_call_operand.hbm [shape: bf16[256,256], index: 7, kind: input, shape index: {}]   ;;  %s3487_s8 = inlined_call_operand.hbm [shape: f32[1,256], index: 8, kind: input, shape index: {}]   ;;  %s3488_s9 = inlined_call_operand.vmem [shape: bf16[128,128], index: 9, kind: input, shape index: {}]   ;;  %s3489_s10 = inlined_call_operand.vmem [shape: f32[1,128], index: 10, kind: input, shape index: {}]   ;;  %s3490_s11 = inlined_call_operand.hbm [shape: bf16[128,128], index: 11, kind: input, shape index: {}]   ;;  %s3491_s12 = inlined_call_operand.vmem [shape: f32[1,128], index: 12, kind: input, shape index: {}]   ;;  %s3492_s13 = inlined_call_operand.vmem [shape: bf16[128,64], index: 13, kind: input, shape index: {}]   ;;  %s3493_s14 = inlined_call_operand.vmem [shape: f32[1,64], index: 14, kind: input, shape index: {}]   ;;  %s3494_s15 = inlined_call_operand.vmem [shape: f32[1,64], index: 15, kind: input, shape index: {}]   ;;  %s3495_s16 = inlined_call_operand.<no memory space> [shape: f32[1,1], index: 16, kind: input, shape index: {}]   ;;  %s3496_s17 = inlined_call_operand.vmem [shape: f32[8,1], index: 17, kind: output, shape index: {}]  }
   0x1   :  { %3499 = sst [smem:[#allocation21_spill]] %s3479_s0  ;;  %v22_v0 = vstv %s3495_s16 }
   0x2   :  { %3500 = sst [smem:[#allocation22_spill]] %s3480_s1  ;;  %23 = vst [vmem:[#allocation2] sm:$0x1] %v22_v0 }
   0x3   :  { %24 = vsyncpa [#allocation4], 0 }
   0x4   :  { %25 = vsyncpa [#allocation6], 0 }
   0x5   :  { %26 = vsyncpa [#allocation9], 0 }
   0x6   :  { %27 = vsyncpa [#allocation12], 0 }
   0x7   :  { %28 = vsyncpa [#allocation15], 0  ;;  %s3104_s26 = smov [#allocation5]   ;;  %s3105_s28 = smov [#allocation8]  }
   0x8   :  { %s47_s27 = sshll.u32 %s3104_s26, 4  ;;  %s69_s29 = sshll.u32 %s3105_s28, 4  ;;  %s48_s27 = int_to_ptr.vmem [resolvable:$true] %s47_s27  ;;  %s70_s29 = int_to_ptr.vmem [resolvable:$true] %s69_s29 }
   0x9   :  { %s2918_s18 = scalar_lea.hbm %s3481_s2, 64 }
   0xa   :  { %p2919_p0 = scmp.ne.s32.totalorder %s3481_s2, %s2918_s18  ;;  %p2922_p1 = scmp.lt.u32.totalorder %s2918_s18, %s3481_s2 }
   0xc   :  { %p2924_p2 = pnand %p2922_p1, %p2919_p0 }
   0xe   :  { %2927 = shalt.err (!%p2924_p2)
}
   0xf   :  { %s2928_s21 = scalar_lea.vmem %s48_s27, 64  ;;  %p2933_p4 = scmp.lt.s32.totalorder %s48_s27, %s48_s27 }
  0x10   :  { %p2929_p3 = scmp.ne.s32.totalorder %s48_s27, %s2928_s21  ;;  %p2934_p5 = scmp.lt.s32.totalorder %s2928_s21, %s2928_s21 }
  0x12   :  { %p2935_p6 = por %p2934_p5, %p2933_p4 }
  0x14   :  { %p2936_p7 = pnand %p2935_p6, %p2929_p3 }
  0x16   :  { %2939 = shalt.err (!%p2936_p7)
}
  0x17   :  { %50 = dma.hbm_to_vmem [thread:$0]  %s3481_s2, 64, %s48_s27, [#allocation6]  }
  0x18   :  { %s2940_s26 = scalar_lea.hbm %s3483_s4, 64 }
  0x19   :  { %p2941_p8 = scmp.ne.s32.totalorder %s3483_s4, %s2940_s26  ;;  %p2944_p9 = scmp.lt.u32.totalorder %s2940_s26, %s3483_s4 }
  0x1b   :  { %p2946_p10 = pnand %p2944_p9, %p2941_p8 }
  0x1d   :  { %2949 = shalt.err (!%p2946_p10)
}
  0x1e   :  { %s2950_s19 = scalar_lea.vmem %s70_s29, 64  ;;  %p2955_p12 = scmp.lt.s32.totalorder %s70_s29, %s70_s29 }
  0x1f   :  { %p2951_p11 = scmp.ne.s32.totalorder %s70_s29, %s2950_s19  ;;  %p2956_p13 = scmp.lt.s32.totalorder %s2950_s19, %s2950_s19 }
  0x21   :  { %p2957_p0 = por %p2956_p13, %p2955_p12 }
  0x23   :  { %p2958_p1 = pnand %p2957_p0, %p2951_p11 }
  0x25   :  { %2961 = shalt.err (!%p2958_p1)
}
  0x26   :  { %72 = dma.hbm_to_vmem [thread:$0]  %s3483_s4, 64, %s70_s29, [#allocation9]  }
  0x27   :  { %s3106_s1 = smov [#allocation11]   ;;  %s3107_s20 = smov [#allocation3]  }
  0x28   :  { %s92_s16 = sshll.u32 %s3106_s1, 4  ;;  %s35_s21 = sshll.u32 %s3107_s20, 4  ;;  %s93_s16 = int_to_ptr.vmem [resolvable:$true] %s92_s16  ;;  %s36_s21 = int_to_ptr.vmem [resolvable:$true] %s35_s21 }
  0x29   :  { %s2962_s24 = scalar_lea.hbm %s3486_s7, 4096 }
  0x2a   :  { %p2963_p2 = scmp.ne.s32.totalorder %s3486_s7, %s2962_s24  ;;  %p2966_p3 = scmp.lt.u32.totalorder %s2962_s24, %s3486_s7 }
  0x2c   :  { %p2968_p4 = pnand %p2966_p3, %p2963_p2 }
  0x2e   :  { %2971 = shalt.err (!%p2968_p4)
}
  0x2f   :  { %s2972_s4 = scalar_lea.vmem %s93_s16, 4096  ;;  %p2977_p6 = scmp.lt.s32.totalorder %s93_s16, %s93_s16 }
  0x30   :  { %p2973_p5 = scmp.ne.s32.totalorder %s93_s16, %s2972_s4  ;;  %p2978_p7 = scmp.lt.s32.totalorder %s2972_s4, %s2972_s4 }
  0x32   :  { %p2979_p8 = por %p2978_p7, %p2977_p6 }
  0x34   :  { %p2980_p9 = pnand %p2979_p8, %p2973_p5 }
  0x36   :  { %2983 = shalt.err (!%p2980_p9)
}
  0x37   :  { %s3108_s29 = smov 128   ;;  %s3109_s30 = smov 8  }
  0x38   :  { %98 = dma.hbm_to_vmem [thread:$0]  %s3486_s7, 4096, %s93_s16, [#allocation12], %s3108_s29, %s3108_s29, %s3109_s30  }
  0x39   :  { %s3501_s1 = sld [smem:[#allocation21_spill]] }
  0x3f   :  { %s2984_s20 = scalar_lea.hbm %s3501_s1, 128 }
  0x40   :  { %p2985_p10 = scmp.ne.s32.totalorder %s3501_s1, %s2984_s20  ;;  %p2988_p11 = scmp.lt.u32.totalorder %s2984_s20, %s3501_s1 }
  0x42   :  { %p2990_p12 = pnand %p2988_p11, %p2985_p10 }
  0x44   :  { %2993 = shalt.err (!%p2990_p12)
}
  0x45   :  { %s2994_s26 = scalar_lea.vmem %s36_s21, 128  ;;  %p2999_p0 = scmp.lt.s32.totalorder %s36_s21, %s36_s21 }
  0x46   :  { %p2995_p13 = scmp.ne.s32.totalorder %s36_s21, %s2994_s26  ;;  %p3000_p1 = scmp.lt.s32.totalorder %s2994_s26, %s2994_s26 }
  0x48   :  { %p3001_p2 = por %p3000_p1, %p2999_p0 }
  0x4a   :  { %p3002_p3 = pnand %p3001_p2, %p2995_p13 }
  0x4c   :  { %3005 = shalt.err (!%p3002_p3)
}
  0x4d   :  { %38 = dma.hbm_to_vmem [thread:$0]  %s3501_s1, 128, %s36_s21, [#allocation4]  }
  0x4e   :  { %s3110_s28 = smov [#allocation7]   ;;  %s3006_s19 = scalar_lea.hbm %s3482_s3, 16384 }
  0x4f   :  { %s56_s0 = sshll.u32 %s3110_s28, 4  ;;  %p3007_p4 = scmp.ne.s32.totalorder %s3482_s3, %s3006_s19  ;;  %s57_s0 = int_to_ptr.vmem [resolvable:$true] %s56_s0 }
  0x50   :  { %p3010_p5 = scmp.lt.u32.totalorder %s3006_s19, %s3482_s3 }
  0x52   :  { %p3012_p6 = pnand %p3010_p5, %p3007_p4 }
  0x54   :  { %3015 = shalt.err (!%p3012_p6)
}
  0x55   :  { %s3016_s23 = scalar_lea.vmem %s57_s0, 16384  ;;  %p3021_p8 = scmp.lt.s32.totalorder %s57_s0, %s57_s0 }
  0x56   :  { %p3017_p7 = scmp.ne.s32.totalorder %s57_s0, %s3016_s23  ;;  %p3022_p9 = scmp.lt.s32.totalorder %s3016_s23, %s3016_s23 }
  0x58   :  { %p3023_p10 = por %p3022_p9, %p3021_p8 }
  0x5a   :  { %p3024_p11 = pnand %p3023_p10, %p3017_p7 }
  0x5c   :  { %3027 = shalt.err (!%p3024_p11)
}
  0x5d   :  { %s3111_s21 = smov 256   ;;  %s3112_s1 = smov 16  }
  0x5e   :  { %62 = dma.hbm_to_vmem [thread:$0]  %s3482_s3, 16384, %s57_s0, [#allocation6], %s3111_s21, %s3111_s21, %s3112_s1  }
  0x5f   :  { %s3113_s26 = smov [#allocation10]   ;;  %s3114_s16 = smov [#allocation13]  }
  0x60   :  { %s78_s7 = sshll.u32 %s3113_s26, 4  ;;  %s105_s28 = sshll.u32 %s3114_s16, 4  ;;  %s79_s7 = int_to_ptr.vmem [resolvable:$true] %s78_s7  ;;  %s106_s28 = int_to_ptr.vmem [resolvable:$true] %s105_s28 }
  0x61   :  { %s3028_s19 = scalar_lea.hbm %s3484_s5, 4096 }
  0x62   :  { %p3029_p12 = scmp.ne.s32.totalorder %s3484_s5, %s3028_s19  ;;  %p3032_p13 = scmp.lt.u32.totalorder %s3028_s19, %s3484_s5 }
  0x64   :  { %p3034_p0 = pnand %p3032_p13, %p3029_p12 }
  0x66   :  { %3037 = shalt.err (!%p3034_p0)
}
  0x67   :  { %s3038_s3 = scalar_lea.vmem %s79_s7, 4096  ;;  %p3043_p2 = scmp.lt.s32.totalorder %s79_s7, %s79_s7 }
  0x68   :  { %p3039_p1 = scmp.ne.s32.totalorder %s79_s7, %s3038_s3  ;;  %p3044_p3 = scmp.lt.s32.totalorder %s3038_s3, %s3038_s3 }
  0x6a   :  { %p3045_p4 = por %p3044_p3, %p3043_p2 }
  0x6c   :  { %p3046_p5 = pnand %p3045_p4, %p3039_p1 }
  0x6e   :  { %3049 = shalt.err (!%p3046_p5)
}
  0x6f   :  { %84 = dma.hbm_to_vmem [thread:$0]  %s3484_s5, 4096, %s79_s7, [#allocation9], %s3108_s29, %s3108_s29, %s3109_s30  }
  0x70   :  { %s3050_s24 = scalar_lea.hbm %s3487_s8, 32 }
  0x71   :  { %p3051_p6 = scmp.ne.s32.totalorder %s3487_s8, %s3050_s24  ;;  %p3054_p7 = scmp.lt.u32.totalorder %s3050_s24, %s3487_s8 }
  0x73   :  { %p3056_p8 = pnand %p3054_p7, %p3051_p6 }
  0x75   :  { %3059 = shalt.err (!%p3056_p8)
}
  0x76   :  { %s3060_s18 = scalar_lea.vmem %s106_s28, 32  ;;  %p3065_p10 = scmp.lt.s32.totalorder %s106_s28, %s106_s28 }
  0x77   :  { %p3061_p9 = scmp.ne.s32.totalorder %s106_s28, %s3060_s18  ;;  %p3066_p11 = scmp.lt.s32.totalorder %s3060_s18, %s3060_s18 }
  0x79   :  { %p3067_p12 = por %p3066_p11, %p3065_p10 }
  0x7b   :  { %p3068_p13 = pnand %p3067_p12, %p3061_p9 }
  0x7d   :  { %3071 = shalt.err (!%p3068_p13)
}
  0x7e   :  { %108 = dma.hbm_to_vmem [thread:$0]  %s3487_s8, 32, %s106_s28, [#allocation12]  }
  0x7f   :  { %s3115_s30 = smov [#allocation14]   ;;  %s3072_s27 = scalar_lea.hbm %s3490_s11, 1024 }
  0x80   :  { %s118_s7 = sshll.u32 %s3115_s30, 4  ;;  %p3073_p0 = scmp.ne.s32.totalorder %s3490_s11, %s3072_s27  ;;  %s119_s7 = int_to_ptr.vmem [resolvable:$true] %s118_s7 }
  0x81   :  { %p3076_p1 = scmp.lt.u32.totalorder %s3072_s27, %s3490_s11 }
  0x83   :  { %p3078_p2 = pnand %p3076_p1, %p3073_p0 }
  0x85   :  { %3081 = shalt.err (!%p3078_p2)
}
  0x86   :  { %s3082_s23 = scalar_lea.vmem %s119_s7, 1024  ;;  %p3087_p4 = scmp.lt.s32.totalorder %s119_s7, %s119_s7 }
  0x87   :  { %p3083_p3 = scmp.ne.s32.totalorder %s119_s7, %s3082_s23  ;;  %p3088_p5 = scmp.lt.s32.totalorder %s3082_s23, %s3082_s23 }
  0x89   :  { %p3089_p6 = por %p3088_p5, %p3087_p4 }
  0x8b   :  { %p3090_p7 = pnand %p3089_p6, %p3083_p3 }
  0x8d   :  { %3093 = shalt.err (!%p3090_p7)
}
  0x8e   :  { %s3116_s8 = smov 64   ;;  %s3117_s28 = smov 4  }
  0x8f   :  { %124 = dma.hbm_to_vmem [thread:$0]  %s3490_s11, 1024, %s119_s7, [#allocation15], %s3116_s8, %s3116_s8, %s3117_s28  }
  0x90   :  { %3094 = dma.done.wait [#allocation4], 128  }
  0x91   :  { %3095 = vsyncadd [#allocation4], 4294967168 }
  0x92   :  { %3096 = dma.done.wait [#allocation6], 16448  }
  0x93   :  { %3097 = vsyncadd [#allocation6], 4294950848 }
  0x94   :  { %3098 = dma.done.wait [#allocation9], 4160  }
  0x95   :  { %3099 = vsyncadd [#allocation9], 4294963136 }
  0x96   :  { %3100 = dma.done.wait [#allocation12], 4128  }
  0x97   :  { %3101 = vsyncadd [#allocation12], 4294963168 }
  0x98   :  { %3102 = dma.done.wait [#allocation15], 1024  }
  0x99   :  { %3103 = vsyncadd [#allocation15], 4294966272  ;;  %v3118_v1 = vmov 0   ;;  %s3502_s26 = sld [smem:[#allocation22_spill]]  ;;  %v160_v6 = vld [vmem:[#allocation3] sm:$0xff]  ;;  %vm232_vm0 = vcmask 261120  }
  0x9a   :  { %268 = vmatprep.mubr.bf16.mxu1 %v3118_v1  ;;  %v161_v8 = vpack.c.bf16 %v160_v6, %v160_v6  ;;  %v2590_v9 = vld [vmem:[#allocation7 + $0x4] ss:$16 sps:$4 sm:$0xff]   ;;  %v2595_v12 = vld [vmem:[#allocation7] ss:$16 sps:$4 sm:$0xff]   ;;  %v2594_v17 = vld [vmem:[#allocation7 + $0xc] ss:$16 sps:$4 sm:$0xff]  }
  0x9b   :  { %1124 = vmatprep.subr.bf16.mxu0 %v2590_v9  ;;  %v2596_v13 = vld [vmem:[#allocation7 + $0x24] ss:$16 sps:$4 sm:$0xff]   ;;  %v2601_v15 = vld [vmem:[#allocation7 + $0x20] ss:$16 sps:$4 sm:$0xff]   ;;  %v2592_v19 = vld [vmem:[#allocation7 + $0x8] ss:$16 sps:$4 sm:$0xff]  }
  0x9c   :  { %1125 = vmatpush1.bf16.msra.mxu0 %v2595_v12  ;;  %v2602_v16 = vld [vmem:[#allocation7 + $0x44] ss:$16 sps:$4 sm:$0xff]   ;;  %v2607_v18 = vld [vmem:[#allocation7 + $0x40] ss:$16 sps:$4 sm:$0xff]   ;;  %v2600_v21 = vld [vmem:[#allocation7 + $0x2c] ss:$16 sps:$4 sm:$0xff]  }
  0x9d   :  { %1126 = vmatprep.subr.bf16.mxu0 %v2596_v13  ;;  %v2608_v20 = vld [vmem:[#allocation7 + $0x64] ss:$16 sps:$4 sm:$0xff]   ;;  %v2598_v22 = vld [vmem:[#allocation7 + $0x28] ss:$16 sps:$4 sm:$0xff]   ;;  %v2613_v23 = vld [vmem:[#allocation7 + $0x60] ss:$16 sps:$4 sm:$0xff]  }
  0x9e   :  { %v2614_v24 = vld [vmem:[#allocation7 + $0x84] ss:$16 sps:$4 sm:$0xff]   ;;  %v2606_v25 = vld [vmem:[#allocation7 + $0x4c] ss:$16 sps:$4 sm:$0xff]   ;;  %v2619_v26 = vld [vmem:[#allocation7 + $0x80] ss:$16 sps:$4 sm:$0xff]  }
  0x9f   :  { %v2578_v2 = vld [vmem:[%s3502_s26 + $0x4] ss:$16 sps:$4 sm:$0xff]   ;;  %v2580_v3 = vld [vmem:[%s3502_s26] ss:$16 sps:$4 sm:$0xff]   ;;  %v2586_v7 = vld [vmem:[%s3502_s26 + $0xc] ss:$16 sps:$4 sm:$0xff]  }
  0xa0   :  { %236 = vmatprep.subr.bf16.mxu1 %v2578_v2  ;;  %v2581_v4 = vld [vmem:[%s3502_s26 + $0x24] ss:$16 sps:$4 sm:$0xff]   ;;  %v2583_v5 = vld [vmem:[%s3502_s26 + $0x20] ss:$16 sps:$4 sm:$0xff]   ;;  %v2584_v10 = vld [vmem:[%s3502_s26 + $0x8] ss:$16 sps:$4 sm:$0xff]   ;;  %1127 = vmatpush1.bf16.msra.mxu0 %v2601_v15 }
  0xa1   :  { %237 = vmatpush1.bf16.msra.mxu1 %v2580_v3  ;;  %v2589_v11 = vld [vmem:[%s3502_s26 + $0x2c] ss:$16 sps:$4 sm:$0xff]   ;;  %v2587_v14 = vld [vmem:[%s3502_s26 + $0x28] ss:$16 sps:$4 sm:$0xff]   ;;  %1128 = vmatprep.subr.bf16.mxu0 %v2602_v16  ;;  %v2620_v28 = vld [vmem:[#allocation7 + $0xa4] ss:$16 sps:$4 sm:$0xff]  }
  0xa2   :  { %238 = vmatprep.subr.bf16.mxu1 %v2581_v4  ;;  %v2604_v27 = vld [vmem:[#allocation7 + $0x48] ss:$16 sps:$4 sm:$0xff]   ;;  %v2612_v29 = vld [vmem:[#allocation7 + $0x6c] ss:$16 sps:$4 sm:$0xff]   ;;  %v2625_v31 = vld [vmem:[#allocation7 + $0xa0] ss:$16 sps:$4 sm:$0xff]  }
  0xa3   :  { %v2610_v30 = vld [vmem:[#allocation7 + $0x68] ss:$16 sps:$4 sm:$0xff]   ;;  %v2626_v32 = vld [vmem:[#allocation7 + $0xc4] ss:$16 sps:$4 sm:$0xff]   ;;  %v2618_v33 = vld [vmem:[#allocation7 + $0x8c] ss:$16 sps:$4 sm:$0xff]  }
  0xa4   :  { %1129 = vmatpush1.bf16.msra.mxu0 %v2607_v18  ;;  %v2631_v34 = vld [vmem:[#allocation7 + $0xc0] ss:$16 sps:$4 sm:$0xff]   ;;  %v2616_v35 = vld [vmem:[#allocation7 + $0x88] ss:$16 sps:$4 sm:$0xff]   ;;  %v2632_v36 = vld [vmem:[#allocation7 + $0xe4] ss:$16 sps:$4 sm:$0xff]  }
  0xa5   :  { %239 = vmatpush1.bf16.msra.mxu1 %v2583_v5  ;;  %1130 = vmatprep.subr.bf16.mxu0 %v2608_v20  ;;  %v2624_v37 = vld [vmem:[#allocation7 + $0xac] ss:$16 sps:$4 sm:$0xff]   ;;  %v2622_v38 = vld [vmem:[#allocation7 + $0xa8] ss:$16 sps:$4 sm:$0xff]   ;;  %v2637_v39 = vld [vmem:[#allocation7 + $0xe0] ss:$16 sps:$4 sm:$0xff]  }
  0xa6   :  { %277 = vmatprep.subr.bf16.mxu1 %v2586_v7  ;;  %v2638_v40 = vld [vmem:[#allocation7 + $0x104] ss:$16 sps:$4 sm:$0xff]   ;;  %v2630_v41 = vld [vmem:[#allocation7 + $0xcc] ss:$16 sps:$4 sm:$0xff]   ;;  %v2643_v42 = vld [vmem:[#allocation7 + $0x100] ss:$16 sps:$4 sm:$0xff]  }
  0xa7   :  { %v2628_v43 = vld [vmem:[#allocation7 + $0xc8] ss:$16 sps:$4 sm:$0xff]   ;;  %v2644_v44 = vld [vmem:[#allocation7 + $0x124] ss:$16 sps:$4 sm:$0xff]   ;;  %v2636_v45 = vld [vmem:[#allocation7 + $0xec] ss:$16 sps:$4 sm:$0xff]  }
  0xa8   :  { %2233 = vmatmul.mubr.msk.bf16.vlgmr.msra.gmra.mrb[0].mxu1 %vm232_vm0, %v161_v8  ;;  %1131 = vmatpush1.bf16.msra.mxu0 %v2613_v23  ;;  %v2634_v46 = vld [vmem:[#allocation7 + $0xe8] ss:$16 sps:$4 sm:$0xff]   ;;  %v2642_v47 = vld [vmem:[#allocation7 + $0x10c] ss:$16 sps:$4 sm:$0xff]   ;;  %v2649_v48 = vld [vmem:[#allocation7 + $0x120] ss:$16 sps:$4 sm:$0xff]  }
  0xa9   :  { %278 = vmatpush1.bf16.msra.mxu1 %v2584_v10  ;;  %309 = vmatprep.mubr.bf16.mxu1 %v3118_v1  ;;  %v2650_v49 = vld [vmem:[#allocation7 + $0x144] ss:$16 sps:$4 sm:$0xff]   ;;  %v2655_v50 = vld [vmem:[#allocation7 + $0x140] ss:$16 sps:$4 sm:$0xff]   ;;  %v2640_v51 = vld [vmem:[#allocation7 + $0x108] ss:$16 sps:$4 sm:$0xff]  }
  0xaa   :  { %279 = vmatprep.subr.bf16.mxu1 %v2589_v11  ;;  %1132 = vmatprep.subr.bf16.mxu0 %v2614_v24  ;;  %v2656_v52 = vld [vmem:[#allocation7 + $0x164] ss:$16 sps:$4 sm:$0xff]   ;;  %v2648_v53 = vld [vmem:[#allocation7 + $0x12c] ss:$16 sps:$4 sm:$0xff]   ;;  %v2661_v54 = vld [vmem:[#allocation7 + $0x160] ss:$16 sps:$4 sm:$0xff]  }
  0xab   :  { %v2646_v55 = vld [vmem:[#allocation7 + $0x128] ss:$16 sps:$4 sm:$0xff]   ;;  %v2662_v56 = vld [vmem:[#allocation7 + $0x184] ss:$16 sps:$4 sm:$0xff]   ;;  %v2654_v57 = vld [vmem:[#allocation7 + $0x14c] ss:$16 sps:$4 sm:$0xff]  }
  0xac   :  { %1133 = vmatpush1.bf16.msra.mxu0 %v2619_v26  ;;  %v2667_v58 = vld [vmem:[#allocation7 + $0x180] ss:$16 sps:$4 sm:$0xff]   ;;  %v2652_v59 = vld [vmem:[#allocation7 + $0x148] ss:$16 sps:$4 sm:$0xff]   ;;  %v2668_v60 = vld [vmem:[#allocation7 + $0x1a4] ss:$16 sps:$4 sm:$0xff]  }
  0xad   :  { %280 = vmatpush1.bf16.msra.mxu1 %v2587_v14  ;;  %1134 = vmatprep.subr.bf16.mxu0 %v2620_v28  ;;  %v2660_v61 = vld [vmem:[#allocation7 + $0x16c] ss:$16 sps:$4 sm:$0xff]   ;;  %v2673_v62 = vld [vmem:[#allocation7 + $0x1a0] ss:$16 sps:$4 sm:$0xff]   ;;  %v2658_v63 = vld [vmem:[#allocation7 + $0x168] ss:$16 sps:$4 sm:$0xff]   ;;  %v172_v14 = vlaneseq }
  0xae   :  { %1206 = vmatprep.subr.bf16.mxu1 %v2594_v17  ;;  %v2666_v0 = vld [vmem:[#allocation7 + $0x18c] ss:$16 sps:$4 sm:$0xff]   ;;  %v2664_v1 = vld [vmem:[#allocation7 + $0x188] ss:$16 sps:$4 sm:$0xff]   ;;  %v2674_v4 = vld [vmem:[#allocation7 + $0x1c4] ss:$16 sps:$4 sm:$0xff]  }
  0xaf   :  { %v2672_v2 = vld [vmem:[#allocation7 + $0x1ac] ss:$16 sps:$4 sm:$0xff]   ;;  %v2670_v3 = vld [vmem:[#allocation7 + $0x1a8] ss:$16 sps:$4 sm:$0xff]   ;;  %v2679_v7 = vld [vmem:[#allocation7 + $0x1c0] ss:$16 sps:$4 sm:$0xff]  }
  0xb0   :  { %2234 = vmatmul.mubr.msk.bf16.vlgmr.msra.gmra.mrb[4].mxu1 %vm232_vm0, %v161_v8  ;;  %1135 = vmatpush1.bf16.msra.mxu0 %v2625_v31  ;;  %v2678_v5 = vld [vmem:[#allocation7 + $0x1cc] ss:$16 sps:$4 sm:$0xff]   ;;  %v2676_v6 = vld [vmem:[#allocation7 + $0x1c8] ss:$16 sps:$4 sm:$0xff]   ;;  %v2680_v8 = vld [vmem:[#allocation7 + $0x1e4] ss:$16 sps:$4 sm:$0xff]  }
  0xb1   :  { %1207 = vmatpush1.bf16.msra.mxu1 %v2592_v19  ;;  %1136 = vmatprep.subr.bf16.mxu0 %v2626_v32  ;;  %v2684_v9 = vld [vmem:[#allocation7 + $0x1ec] ss:$16 sps:$4 sm:$0xff]   ;;  %v2682_v10 = vld [vmem:[#allocation7 + $0x1e8] ss:$16 sps:$4 sm:$0xff]   ;;  %v2685_v11 = vld [vmem:[#allocation7 + $0x1e0] ss:$16 sps:$4 sm:$0xff]  }
  0xb2   :  { %1208 = vmatprep.subr.bf16.mxu1 %v2600_v21  ;;  %v2688_v12 = vld [vmem:[#allocation7 + $0x204] ss:$16 sps:$4 sm:$0xff]   ;;  %v2691_v13 = vld [vmem:[#allocation7 + $0x20c] ss:$16 sps:$4 sm:$0xff]   ;;  %v3342_v15 = vshrl.u32 %v172_v14, 7  ;;  %vm3120_vm5 = vmmov 0  }
  0xb3   :  { %v3347_v17 = vld [vmem:[#allocation5] sm:$0xf]  ;;  %vm2202_vm6 = vcmask 523264   ;;  %vm2214_vm7 = vcmask 7168  }
  0xb4   :  { %1137 = vmatpush1.bf16.msra.mxu0 %v2631_v34  ;;  %v3345_v16 = vsub.s32 0, %v3342_v15  ;;  %v3350_v18 = vsub.s32 1, %v3342_v15  ;;  %v186_v26 = vsub.s32 3, %v3342_v15  ;;  %v2686_v34 = vld [vmem:[#allocation7 + $0x200] ss:$16 sps:$4 sm:$0xff]  }
  0xb5   :  { %1209 = vmatpush1.bf16.msra.mxu1 %v2598_v22  ;;  %1138 = vmatprep.subr.bf16.mxu0 %v2632_v36  ;;  %v2745_v14 = vld [vmem:[#allocation7 + $0x32c] ss:$16 sps:$4 sm:$0xff]  }
  0xb6   :  { %1210 = vmatprep.subr.bf16.mxu1 %v2606_v25  ;;  %v175_v19 = vrot.slane %v3347_v17, %v3345_v16  ;;  %v179_v20 = vrot.slane %v3347_v17, %v3350_v18  ;;  %v187_v32 = vrot.slane %v3347_v17, %v186_v26 }
  0xb8   :  { %1139 = vmatpush1.bf16.msra.mxu0 %v2637_v39 }
  0xb9   :  { %1211 = vmatpush1.bf16.msra.mxu1 %v2604_v27  ;;  %1140 = vmatprep.subr.bf16.mxu0 %v2638_v40 }
  0xba   :  { %1212 = vmatprep.subr.bf16.mxu1 %v2612_v29 }
  0xbc   :  { %1141 = vmatpush1.bf16.msra.mxu0 %v2643_v42 }
  0xbd   :  { %1213 = vmatpush1.bf16.msra.mxu1 %v2610_v30  ;;  %1142 = vmatprep.subr.bf16.mxu0 %v2644_v44  ;;  %v2695_v44 = vld [vmem:[#allocation7 + $0x228] ss:$16 sps:$4 sm:$0xff]  }
  0xbe   :  { %1214 = vmatprep.subr.bf16.mxu1 %v2618_v33 }
  0xc0   :  { %1143 = vmatpush1.bf16.msra.mxu0 %v2649_v48 }
  0xc1   :  { %1215 = vmatpush1.bf16.msra.mxu1 %v2616_v35  ;;  %1144 = vmatprep.subr.bf16.mxu0 %v2650_v49  ;;  %v2689_v35 = vld [vmem:[#allocation7 + $0x208] ss:$16 sps:$4 sm:$0xff]  }
  0xc2   :  { %1216 = vmatprep.subr.bf16.mxu1 %v2624_v37  ;;  %v2694_v37 = vld [vmem:[#allocation7 + $0x224] ss:$16 sps:$4 sm:$0xff]  }
  0xc4   :  { %1145 = vmatpush1.bf16.msra.mxu0 %v2655_v50  ;;  %v2698_v50 = vld [vmem:[#allocation7 + $0x240] ss:$16 sps:$4 sm:$0xff]  }
  0xc5   :  { %1217 = vmatpush1.bf16.msra.mxu1 %v2622_v38  ;;  %1146 = vmatprep.subr.bf16.mxu0 %v2656_v52  ;;  %v2697_v38 = vld [vmem:[#allocation7 + $0x22c] ss:$16 sps:$4 sm:$0xff]  }
  0xc6   :  { %1218 = vmatprep.subr.bf16.mxu1 %v2630_v41  ;;  %v2692_v41 = vld [vmem:[#allocation7 + $0x220] ss:$16 sps:$4 sm:$0xff]  }
  0xc8   :  { %1147 = vmatpush1.bf16.msra.mxu0 %v2661_v54  ;;  %v2709_v54 = vld [vmem:[#allocation7 + $0x26c] ss:$16 sps:$4 sm:$0xff]  }
  0xc9   :  { %1219 = vmatpush1.bf16.msra.mxu1 %v2628_v43  ;;  %1148 = vmatprep.subr.bf16.mxu0 %v2662_v56  ;;  %v2707_v56 = vld [vmem:[#allocation7 + $0x268] ss:$16 sps:$4 sm:$0xff]  }
  0xca   :  { %1220 = vmatprep.subr.bf16.mxu1 %v2636_v45  ;;  %v2700_v45 = vld [vmem:[#allocation7 + $0x244] ss:$16 sps:$4 sm:$0xff]  }
  0xcc   :  { %1149 = vmatpush1.bf16.msra.mxu0 %v2667_v58  ;;  %v2715_v58 = vld [vmem:[#allocation7 + $0x28c] ss:$16 sps:$4 sm:$0xff]  }
  0xcd   :  { %1221 = vmatpush1.bf16.msra.mxu1 %v2634_v46  ;;  %1150 = vmatprep.subr.bf16.mxu0 %v2668_v60  ;;  %v2713_v60 = vld [vmem:[#allocation7 + $0x288] ss:$16 sps:$4 sm:$0xff]  }
  0xce   :  { %1222 = vmatprep.subr.bf16.mxu1 %v2642_v47  ;;  %v2703_v47 = vld [vmem:[#allocation7 + $0x24c] ss:$16 sps:$4 sm:$0xff]  }
  0xd0   :  { %1151 = vmatpush1.bf16.msra.mxu0 %v2673_v62  ;;  %v2721_v62 = vld [vmem:[#allocation7 + $0x2ac] ss:$16 sps:$4 sm:$0xff]  }
  0xd1   :  { %1223 = vmatpush1.bf16.msra.mxu1 %v2640_v51  ;;  %1152 = vmatprep.subr.bf16.mxu0 %v2674_v4  ;;  %v2701_v51 = vld [vmem:[#allocation7 + $0x248] ss:$16 sps:$4 sm:$0xff]  }
  0xd2   :  { %1224 = vmatprep.subr.bf16.mxu1 %v2648_v53  ;;  %v2706_v53 = vld [vmem:[#allocation7 + $0x264] ss:$16 sps:$4 sm:$0xff]   ;;  %v2725_v4 = vld [vmem:[#allocation7 + $0x2c8] ss:$16 sps:$4 sm:$0xff]  }
  0xd4   :  { %1153 = vmatpush1.bf16.msra.mxu0 %v2679_v7  ;;  %v2728_v7 = vld [vmem:[#allocation7 + $0x2e0] ss:$16 sps:$4 sm:$0xff]  }
  0xd5   :  { %1225 = vmatpush1.bf16.msra.mxu1 %v2646_v55  ;;  %1154 = vmatprep.subr.bf16.mxu0 %v2680_v8  ;;  %v2704_v55 = vld [vmem:[#allocation7 + $0x260] ss:$16 sps:$4 sm:$0xff]   ;;  %v2731_v8 = vld [vmem:[#allocation7 + $0x2e8] ss:$16 sps:$4 sm:$0xff]  }
  0xd6   :  { %1226 = vmatprep.subr.bf16.mxu1 %v2654_v57  ;;  %v2712_v57 = vld [vmem:[#allocation7 + $0x284] ss:$16 sps:$4 sm:$0xff]  }
  0xd8   :  { %1155 = vmatpush1.bf16.msra.mxu0 %v2685_v11  ;;  %v2734_v11 = vld [vmem:[#allocation7 + $0x300] ss:$16 sps:$4 sm:$0xff]  }
  0xd9   :  { %1227 = vmatpush1.bf16.msra.mxu1 %v2652_v59  ;;  %1165 = vmatprep.subr.bf16.mxu0 %v2688_v12  ;;  %v2710_v59 = vld [vmem:[#allocation7 + $0x280] ss:$16 sps:$4 sm:$0xff]   ;;  %v2737_v12 = vld [vmem:[#allocation7 + $0x308] ss:$16 sps:$4 sm:$0xff]  }
  0xda   :  { %1228 = vmatprep.subr.bf16.mxu1 %v2660_v61  ;;  %v2718_v61 = vld [vmem:[#allocation7 + $0x2a4] ss:$16 sps:$4 sm:$0xff]  }
  0xdd   :  { %1229 = vmatpush1.bf16.msra.mxu1 %v2658_v63  ;;  %v2716_v63 = vld [vmem:[#allocation7 + $0x2a0] ss:$16 sps:$4 sm:$0xff]  }
  0xde   :  { %1230 = vmatprep.subr.bf16.mxu1 %v2666_v0  ;;  %v2719_v0 = vld [vmem:[#allocation7 + $0x2a8] ss:$16 sps:$4 sm:$0xff]  }
  0xe1   :  { %1231 = vmatpush1.bf16.msra.mxu1 %v2664_v1  ;;  %v2724_v1 = vld [vmem:[#allocation7 + $0x2c4] ss:$16 sps:$4 sm:$0xff]  }
  0xe2   :  { %1232 = vmatprep.subr.bf16.mxu1 %v2672_v2  ;;  %v2727_v2 = vld [vmem:[#allocation7 + $0x2cc] ss:$16 sps:$4 sm:$0xff]  }
  0xe5   :  { %1233 = vmatpush1.bf16.msra.mxu1 %v2670_v3  ;;  %v2722_v3 = vld [vmem:[#allocation7 + $0x2c0] ss:$16 sps:$4 sm:$0xff]  }
  0xe6   :  { %1234 = vmatprep.subr.bf16.mxu1 %v2678_v5  ;;  %v2730_v5 = vld [vmem:[#allocation7 + $0x2e4] ss:$16 sps:$4 sm:$0xff]  }
  0xe9   :  { %1235 = vmatpush1.bf16.msra.mxu1 %v2676_v6  ;;  %v2733_v6 = vld [vmem:[#allocation7 + $0x2ec] ss:$16 sps:$4 sm:$0xff]  }
  0xea   :  { %1236 = vmatprep.subr.bf16.mxu1 %v2684_v9  ;;  %v2736_v9 = vld [vmem:[#allocation7 + $0x304] ss:$16 sps:$4 sm:$0xff]  }
  0xed   :  { %1237 = vmatpush1.bf16.msra.mxu1 %v2682_v10  ;;  %v2739_v10 = vld [vmem:[#allocation7 + $0x30c] ss:$16 sps:$4 sm:$0xff]  }
  0xee   :  { %1247 = vmatprep.subr.bf16.mxu1 %v2691_v13  ;;  %v2742_v13 = vld [vmem:[#allocation7 + $0x324] ss:$16 sps:$4 sm:$0xff]  }
 0x17b   :  { %v270_v21 = vpop.f32.mrb[0].mxu1 }
 0x17c   :  { %v271_v22 = vadd.f32 %v270_v21, %v175_v19  ;;  %v272_v23 = vpop.f32.mrb[1].mxu1  ;;  %v2740_v19 = vld [vmem:[#allocation7 + $0x320] ss:$16 sps:$4 sm:$0xff]   ;;  %v2748_v21 = vld [vmem:[#allocation7 + $0x344] ss:$16 sps:$4 sm:$0xff]  }
 0x17d   :  { %v273_v24 = vadd.f32 %v272_v23, %v179_v20  ;;  %v274_v25 = vpop.f32.mrb[2].mxu1  ;;  %v2743_v20 = vld [vmem:[#allocation7 + $0x328] ss:$16 sps:$4 sm:$0xff]   ;;  %v2746_v23 = vld [vmem:[#allocation7 + $0x340] ss:$16 sps:$4 sm:$0xff]  }
 0x17e   :  { %vm318_vm1 = vcmp.gt.f32.partialorder %v271_v22, 0.0  ;;  %v322_v27 = vmul.f32 0.1, %v271_v22  ;;  %v275_v28 = vpop.f32.mrb[3].mxu1  ;;  %v2754_v25 = vld [vmem:[#allocation7 + $0x364] ss:$16 sps:$4 sm:$0xff]  }
 0x17f   :  { %v323_v29 = vmul.f32 0.1, %v273_v24  ;;  %vm319_vm2 = vcmp.gt.f32.partialorder %v273_v24, 0.0  ;;  %v2752_v28 = vld [vmem:[#allocation7 + $0x360] ss:$16 sps:$4 sm:$0xff]  }
 0x180   :  { %v326_v30 = vsel %vm318_vm1, %v271_v22, %v322_v27  ;;  %v2751_v22 = vld [vmem:[#allocation7 + $0x34c] ss:$16 sps:$4 sm:$0xff]  }
 0x181   :  { %v327_v31 = vsel %vm319_vm2, %v273_v24, %v323_v29  ;;  %v330_v36 = vpack.c.bf16 %v326_v30, %v326_v30  ;;  %v2749_v24 = vld [vmem:[#allocation7 + $0x348] ss:$16 sps:$4 sm:$0xff]   ;;  %v2757_v27 = vld [vmem:[#allocation7 + $0x36c] ss:$16 sps:$4 sm:$0xff]   ;;  %v2760_v30 = vld [vmem:[#allocation7 + $0x384] ss:$16 sps:$4 sm:$0xff]  }
 0x182   :  { %v331_v33 = vpack.c.bf16 %v327_v31, %v327_v31  ;;  %v2755_v29 = vld [vmem:[#allocation7 + $0x368] ss:$16 sps:$4 sm:$0xff]   ;;  %v2763_v31 = vld [vmem:[#allocation7 + $0x38c] ss:$16 sps:$4 sm:$0xff]  }
 0x183   :  { %v3360_v39 = vpop.f32.mrb[4].mxu1 }
 0x184   :  { %1156 = vmatprep.mubr.bf16.mxu0 %v331_v33  ;;  %1238 = vmatprep.mubr.bf16.mxu1 %v331_v33  ;;  %v313_v40 = vpop.f32.mrb[5].mxu1  ;;  %v2758_v33 = vld [vmem:[#allocation7 + $0x380] ss:$16 sps:$4 sm:$0xff]  }
 0x185   :  { %1157 = vmatmul.mubr.bf16.vlgmr.msra.gmra.mrb[0].mxu0 %v330_v36  ;;  %1239 = vmatmul.mubr.bf16.vlgmr.msra.gmra.mrb[8].mxu1 %v330_v36  ;;  %v314_v42 = vadd.f32 %v313_v40, %v187_v32  ;;  %v315_v43 = vpop.f32.mrb[6].mxu1  ;;  %v182_v32 = vsub.s32 2, %v3342_v15  ;;  %v2769_v36 = vld [vmem:[#allocation7 + $0x3ac] ss:$16 sps:$4 sm:$0xff]   ;;  %v2767_v40 = vld [vmem:[#allocation7 + $0x3a8] ss:$16 sps:$4 sm:$0xff]  }
 0x186   :  { %1166 = vmatpush1.bf16.msra.mxu0 %v2686_v34  ;;  %1248 = vmatpush1.bf16.msra.mxu1 %v2689_v35  ;;  %v316_v46 = vpop.f32.mrb[7].mxu1  ;;  %v2761_v34 = vld [vmem:[#allocation7 + $0x388] ss:$16 sps:$4 sm:$0xff]   ;;  %v2766_v35 = vld [vmem:[#allocation7 + $0x3a4] ss:$16 sps:$4 sm:$0xff]  }
 0x187   :  { %1167 = vmatprep.subr.bf16.mxu0 %v2694_v37  ;;  %1249 = vmatprep.subr.bf16.mxu1 %v2697_v38  ;;  %vm321_vm3 = vcmp.gt.f32.partialorder %v314_v42, 0.0  ;;  %v325_v48 = vmul.f32 0.1, %v314_v42  ;;  %v183_v37 = vrot.slane %v3347_v17, %v182_v32  ;;  %v2764_v38 = vld [vmem:[#allocation7 + $0x3a0] ss:$16 sps:$4 sm:$0xff]  }
 0x188   :  { %v2778_v46 = vld [vmem:[#allocation7 + $0x3e4] ss:$16 sps:$4 sm:$0xff]   ;;  %v2776_v17 = vld [vmem:[#allocation7 + $0x3e0] ss:$16 sps:$4 sm:$0xff]  }
 0x189   :  { %v329_v49 = vsel %vm321_vm3, %v314_v42, %v325_v48  ;;  %v2775_v42 = vld [vmem:[#allocation7 + $0x3cc] ss:$16 sps:$4 sm:$0xff]   ;;  %v312_v43 = vadd.f32 %v3360_v39, %v183_v37  ;;  %v2850_v37 = vld [vmem:[#allocation11 + $0x64] ss:$8 sps:$4 sm:$0xff]  }
 0x18a   :  { %1168 = vmatpush1.bf16.msra.mxu0 %v2692_v41  ;;  %1250 = vmatpush1.bf16.msra.mxu1 %v2695_v44  ;;  %v333_v52 = vpack.c.bf16 %v329_v49, %v329_v49  ;;  %v2772_v41 = vld [vmem:[#allocation7 + $0x3c4] ss:$16 sps:$4 sm:$0xff]   ;;  %v2770_v44 = vld [vmem:[#allocation7 + $0x3c0] ss:$16 sps:$4 sm:$0xff]   ;;  %v2779_v49 = vld [vmem:[#allocation7 + $0x3e8] ss:$16 sps:$4 sm:$0xff]  }
 0x18b   :  { %1169 = vmatprep.subr.bf16.mxu0 %v2700_v45  ;;  %1251 = vmatprep.subr.bf16.mxu1 %v2703_v47  ;;  %v2773_v45 = vld [vmem:[#allocation7 + $0x3c8] ss:$16 sps:$4 sm:$0xff]   ;;  %v2781_v47 = vld [vmem:[#allocation7 + $0x3ec] ss:$16 sps:$4 sm:$0xff]   ;;  %v324_v48 = vmul.f32 0.1, %v312_v43 }
 0x18c   :  { %1197 = vmatprep.mubr.bf16.mxu0 %v333_v52  ;;  %1279 = vmatprep.mubr.bf16.mxu1 %v333_v52  ;;  %vm320_vm4 = vcmp.gt.f32.partialorder %v312_v43, 0.0  ;;  %v2782_v39 = vld [vmem:[#allocation10] ss:$8 sps:$4 sm:$0xff]  }
 0x18e   :  { %1170 = vmatpush1.bf16.msra.mxu0 %v2698_v50  ;;  %1252 = vmatpush1.bf16.msra.mxu1 %v2701_v51  ;;  %v2784_v50 = vld [vmem:[#allocation10 + $0x4] ss:$8 sps:$4 sm:$0xff]   ;;  %v328_v51 = vsel %vm320_vm4, %v312_v43, %v324_v48 }
 0x18f   :  { %1171 = vmatprep.subr.bf16.mxu0 %v2706_v53  ;;  %1253 = vmatprep.subr.bf16.mxu1 %v2709_v54  ;;  %v332_v52 = vpack.c.bf16 %v328_v51, %v328_v51  ;;  %v2787_v53 = vld [vmem:[#allocation10 + $0x14] ss:$8 sps:$4 sm:$0xff]   ;;  %v2785_v54 = vld [vmem:[#allocation10 + $0x10] ss:$8 sps:$4 sm:$0xff]  }
 0x192   :  { %1172 = vmatpush1.bf16.msra.mxu0 %v2704_v55  ;;  %1254 = vmatpush1.bf16.msra.mxu1 %v2707_v56  ;;  %v2790_v55 = vld [vmem:[#allocation10 + $0x24] ss:$8 sps:$4 sm:$0xff]   ;;  %v2788_v56 = vld [vmem:[#allocation10 + $0x20] ss:$8 sps:$4 sm:$0xff]  }
 0x193   :  { %1173 = vmatprep.subr.bf16.mxu0 %v2712_v57  ;;  %1255 = vmatprep.subr.bf16.mxu1 %v2715_v58  ;;  %v2793_v57 = vld [vmem:[#allocation10 + $0x34] ss:$8 sps:$4 sm:$0xff]   ;;  %v2791_v58 = vld [vmem:[#allocation10 + $0x30] ss:$8 sps:$4 sm:$0xff]  }
 0x196   :  { %1174 = vmatpush1.bf16.msra.mxu0 %v2710_v59  ;;  %1256 = vmatpush1.bf16.msra.mxu1 %v2713_v60  ;;  %v2796_v59 = vld [vmem:[#allocation10 + $0x44] ss:$8 sps:$4 sm:$0xff]   ;;  %v2794_v60 = vld [vmem:[#allocation10 + $0x40] ss:$8 sps:$4 sm:$0xff]  }
 0x197   :  { %1175 = vmatprep.subr.bf16.mxu0 %v2718_v61  ;;  %1257 = vmatprep.subr.bf16.mxu1 %v2721_v62  ;;  %v2799_v61 = vld [vmem:[#allocation10 + $0x54] ss:$8 sps:$4 sm:$0xff]   ;;  %v2797_v62 = vld [vmem:[#allocation10 + $0x50] ss:$8 sps:$4 sm:$0xff]  }
 0x19a   :  { %1176 = vmatpush1.bf16.msra.mxu0 %v2716_v63  ;;  %1258 = vmatpush1.bf16.msra.mxu1 %v2719_v0  ;;  %v2802_v63 = vld [vmem:[#allocation10 + $0x64] ss:$8 sps:$4 sm:$0xff]   ;;  %v2800_v0 = vld [vmem:[#allocation10 + $0x60] ss:$8 sps:$4 sm:$0xff]  }
 0x19b   :  { %1177 = vmatprep.subr.bf16.mxu0 %v2724_v1  ;;  %1259 = vmatprep.subr.bf16.mxu1 %v2727_v2  ;;  %v2805_v1 = vld [vmem:[#allocation10 + $0x74] ss:$8 sps:$4 sm:$0xff]   ;;  %v2803_v2 = vld [vmem:[#allocation10 + $0x70] ss:$8 sps:$4 sm:$0xff]  }
 0x19e   :  { %1178 = vmatpush1.bf16.msra.mxu0 %v2722_v3  ;;  %1260 = vmatpush1.bf16.msra.mxu1 %v2725_v4  ;;  %v2808_v3 = vld [vmem:[#allocation10 + $0x84] ss:$8 sps:$4 sm:$0xff]   ;;  %v2806_v4 = vld [vmem:[#allocation10 + $0x80] ss:$8 sps:$4 sm:$0xff]  }
 0x19f   :  { %1179 = vmatprep.subr.bf16.mxu0 %v2730_v5  ;;  %1261 = vmatprep.subr.bf16.mxu1 %v2733_v6  ;;  %v2811_v5 = vld [vmem:[#allocation10 + $0x94] ss:$8 sps:$4 sm:$0xff]   ;;  %v2809_v6 = vld [vmem:[#allocation10 + $0x90] ss:$8 sps:$4 sm:$0xff]  }
 0x1a2   :  { %1180 = vmatpush1.bf16.msra.mxu0 %v2728_v7  ;;  %1262 = vmatpush1.bf16.msra.mxu1 %v2731_v8  ;;  %v2814_v7 = vld [vmem:[#allocation10 + $0xa4] ss:$8 sps:$4 sm:$0xff]   ;;  %v2812_v8 = vld [vmem:[#allocation10 + $0xa0] ss:$8 sps:$4 sm:$0xff]  }
 0x1a3   :  { %1181 = vmatprep.subr.bf16.mxu0 %v2736_v9  ;;  %1263 = vmatprep.subr.bf16.mxu1 %v2739_v10  ;;  %v2815_v9 = vld [vmem:[#allocation10 + $0xb0] ss:$8 sps:$4 sm:$0xff]   ;;  %v2817_v10 = vld [vmem:[#allocation10 + $0xb4] ss:$8 sps:$4 sm:$0xff]  }
 0x1a6   :  { %1182 = vmatpush1.bf16.msra.mxu0 %v2734_v11  ;;  %1264 = vmatpush1.bf16.msra.mxu1 %v2737_v12  ;;  %v2820_v11 = vld [vmem:[#allocation10 + $0xc4] ss:$8 sps:$4 sm:$0xff]   ;;  %v2818_v12 = vld [vmem:[#allocation10 + $0xc0] ss:$8 sps:$4 sm:$0xff]  }
 0x1a7   :  { %1183 = vmatprep.subr.bf16.mxu0 %v2742_v13  ;;  %1265 = vmatprep.subr.bf16.mxu1 %v2745_v14  ;;  %v2823_v13 = vld [vmem:[#allocation10 + $0xd4] ss:$8 sps:$4 sm:$0xff]   ;;  %v2821_v14 = vld [vmem:[#allocation10 + $0xd0] ss:$8 sps:$4 sm:$0xff]  }
 0x1aa   :  { %1184 = vmatpush1.bf16.msra.mxu0 %v2740_v19  ;;  %1266 = vmatpush1.bf16.msra.mxu1 %v2743_v20  ;;  %v2826_v19 = vld [vmem:[#allocation10 + $0xe4] ss:$8 sps:$4 sm:$0xff]   ;;  %v2824_v20 = vld [vmem:[#allocation10 + $0xe0] ss:$8 sps:$4 sm:$0xff]  }
 0x1ab   :  { %1185 = vmatprep.subr.bf16.mxu0 %v2748_v21  ;;  %1267 = vmatprep.subr.bf16.mxu1 %v2751_v22  ;;  %v2829_v21 = vld [vmem:[#allocation10 + $0xf4] ss:$8 sps:$4 sm:$0xff]   ;;  %v2827_v22 = vld [vmem:[#allocation10 + $0xf0] ss:$8 sps:$4 sm:$0xff]  }
 0x1ae   :  { %1186 = vmatpush1.bf16.msra.mxu0 %v2746_v23  ;;  %1268 = vmatpush1.bf16.msra.mxu1 %v2749_v24  ;;  %v2830_v23 = vld [vmem:[#allocation11] ss:$8 sps:$4 sm:$0xff]   ;;  %v2832_v24 = vld [vmem:[#allocation11 + $0x4] ss:$8 sps:$4 sm:$0xff]  }
 0x1af   :  { %1187 = vmatprep.subr.bf16.mxu0 %v2754_v25  ;;  %1269 = vmatprep.subr.bf16.mxu1 %v2757_v27  ;;  %v2835_v25 = vld [vmem:[#allocation11 + $0x14] ss:$8 sps:$4 sm:$0xff]   ;;  %v2833_v27 = vld [vmem:[#allocation11 + $0x10] ss:$8 sps:$4 sm:$0xff]  }
 0x1b2   :  { %1188 = vmatpush1.bf16.msra.mxu0 %v2752_v28  ;;  %1270 = vmatpush1.bf16.msra.mxu1 %v2755_v29  ;;  %v2838_v28 = vld [vmem:[#allocation11 + $0x24] ss:$8 sps:$4 sm:$0xff]   ;;  %v2836_v29 = vld [vmem:[#allocation11 + $0x20] ss:$8 sps:$4 sm:$0xff]  }
 0x1b3   :  { %1189 = vmatprep.subr.bf16.mxu0 %v2760_v30  ;;  %1271 = vmatprep.subr.bf16.mxu1 %v2763_v31  ;;  %v2841_v30 = vld [vmem:[#allocation11 + $0x34] ss:$8 sps:$4 sm:$0xff]   ;;  %v2839_v31 = vld [vmem:[#allocation11 + $0x30] ss:$8 sps:$4 sm:$0xff]  }
 0x1b6   :  { %1190 = vmatpush1.bf16.msra.mxu0 %v2758_v33  ;;  %1272 = vmatpush1.bf16.msra.mxu1 %v2761_v34  ;;  %v2844_v33 = vld [vmem:[#allocation11 + $0x44] ss:$8 sps:$4 sm:$0xff]   ;;  %v2842_v34 = vld [vmem:[#allocation11 + $0x40] ss:$8 sps:$4 sm:$0xff]  }
 0x1b7   :  { %1191 = vmatprep.subr.bf16.mxu0 %v2766_v35  ;;  %1273 = vmatprep.subr.bf16.mxu1 %v2769_v36  ;;  %v2847_v35 = vld [vmem:[#allocation11 + $0x54] ss:$8 sps:$4 sm:$0xff]   ;;  %v2845_v36 = vld [vmem:[#allocation11 + $0x50] ss:$8 sps:$4 sm:$0xff]  }
 0x1ba   :  { %1192 = vmatpush1.bf16.msra.mxu0 %v2764_v38  ;;  %1274 = vmatpush1.bf16.msra.mxu1 %v2767_v40  ;;  %v2848_v38 = vld [vmem:[#allocation11 + $0x60] ss:$8 sps:$4 sm:$0xff]   ;;  %v2853_v40 = vld [vmem:[#allocation11 + $0x74] ss:$8 sps:$4 sm:$0xff]  }
 0x1bb   :  { %1193 = vmatprep.subr.bf16.mxu0 %v2772_v41  ;;  %1275 = vmatprep.subr.bf16.mxu1 %v2775_v42  ;;  %v2851_v41 = vld [vmem:[#allocation11 + $0x70] ss:$8 sps:$4 sm:$0xff]   ;;  %v3367_v42 = vld [vmem:[#allocation8] sm:$0xf] }
 0x1bc   :  { %v475_v43 = vrot.slane %v3367_v42, %v182_v32 }
 0x1be   :  { %1194 = vmatpush1.bf16.msra.mxu0 %v2770_v44  ;;  %1276 = vmatpush1.bf16.msra.mxu1 %v2773_v45  ;;  %v479_v44 = vrot.slane %v3367_v42, %v186_v26 }
 0x1bf   :  { %1195 = vmatprep.subr.bf16.mxu0 %v2778_v46  ;;  %1277 = vmatprep.subr.bf16.mxu1 %v2781_v47 }
 0x1c2   :  { %1196 = vmatpush1.bf16.msra.mxu0 %v2776_v17  ;;  %1278 = vmatpush1.bf16.msra.mxu1 %v2779_v49 }
 0x1c3   :  { %1512 = vmatprep.subr.bf16.mxu0 %v2784_v50  ;;  %1779 = vmatprep.subr.bf16.mxu1 %v2832_v24  ;;  %v467_v24 = vrot.slane %v3367_v42, %v3345_v16 }
 0x1c5   :  { %1198 = vmatmul.mubr.bf16.vlgmr.msra.gmra.mrb[0].mxu0 %v332_v52  ;;  %1280 = vmatmul.mubr.bf16.vlgmr.msra.gmra.mrb[8].mxu1 %v332_v52 }
 0x1c6   :  { %1513 = vmatpush1.bf16.msra.mxu0 %v2782_v39  ;;  %1780 = vmatpush1.bf16.msra.mxu1 %v2830_v23  ;;  %v1340_v23 = vld [vmem:[%s3485_s6] sm:$0x3] }
 0x1c7   :  { %1514 = vmatprep.subr.bf16.mxu0 %v2787_v53  ;;  %1781 = vmatprep.subr.bf16.mxu1 %v2835_v25  ;;  %v1345_v25 = vrot.slane %v1340_v23, %v3345_v16 }
 0x1ca   :  { %1515 = vmatpush1.bf16.msra.mxu0 %v2785_v54  ;;  %1782 = vmatpush1.bf16.msra.mxu1 %v2833_v27  ;;  %v471_v27 = vrot.slane %v3367_v42, %v3350_v18 }
 0x1cb   :  { %1516 = vmatprep.subr.bf16.mxu0 %v2790_v55  ;;  %1783 = vmatprep.subr.bf16.mxu1 %v2838_v28  ;;  %v1349_v28 = vrot.slane %v1340_v23, %v3350_v18  ;;  %v2890_v23 = vld [vmem:[#allocation14 + $0x20] sm:$0xff]  }
 0x1ce   :  { %1517 = vmatpush1.bf16.msra.mxu0 %v2788_v56  ;;  %1784 = vmatpush1.bf16.msra.mxu1 %v2836_v29  ;;  %v2543_v29 = vadd.f32 %v1345_v25, %v467_v24  ;;  %v2891_v24 = vld [vmem:[#allocation14 + $0x28] sm:$0xff]   ;;  %v2892_v25 = vld [vmem:[#allocation14 + $0x30] sm:$0xff]  }
 0x1cf   :  { %1518 = vmatprep.subr.bf16.mxu0 %v2793_v57  ;;  %1785 = vmatprep.subr.bf16.mxu1 %v2841_v30  ;;  %v2545_v30 = vadd.f32 %v1349_v28, %v471_v27  ;;  %v2893_v27 = vld [vmem:[#allocation14 + $0x38] sm:$0xff]   ;;  %v2894_v28 = vld [vmem:[%s3492_s13] sm:$0xff]  }
 0x1d2   :  { %1519 = vmatpush1.bf16.msra.mxu0 %v2791_v58  ;;  %1786 = vmatpush1.bf16.msra.mxu1 %v2839_v31 }
 0x1d3   :  { %1520 = vmatprep.subr.bf16.mxu0 %v2796_v59  ;;  %1787 = vmatprep.subr.bf16.mxu1 %v2844_v33 }
 0x1d6   :  { %1521 = vmatpush1.bf16.msra.mxu0 %v2794_v60  ;;  %1788 = vmatpush1.bf16.msra.mxu1 %v2842_v34 }
 0x1d7   :  { %1522 = vmatprep.subr.bf16.mxu0 %v2799_v61  ;;  %1789 = vmatprep.subr.bf16.mxu1 %v2847_v35 }
 0x1da   :  { %1523 = vmatpush1.bf16.msra.mxu0 %v2797_v62  ;;  %1790 = vmatpush1.bf16.msra.mxu1 %v2845_v36 }
 0x1db   :  { %1524 = vmatprep.subr.bf16.mxu0 %v2802_v63  ;;  %1791 = vmatprep.subr.bf16.mxu1 %v2850_v37 }
 0x1de   :  { %1525 = vmatpush1.bf16.msra.mxu0 %v2800_v0  ;;  %1792 = vmatpush1.bf16.msra.mxu1 %v2848_v38 }
 0x1df   :  { %1526 = vmatprep.subr.bf16.mxu0 %v2805_v1  ;;  %1793 = vmatprep.subr.bf16.mxu1 %v2853_v40 }
 0x1e2   :  { %1527 = vmatpush1.bf16.msra.mxu0 %v2803_v2  ;;  %1794 = vmatpush1.bf16.msra.mxu1 %v2851_v41  ;;  %v2856_v2 = vld [vmem:[#allocation11 + $0x84] ss:$8 sps:$4 sm:$0xff]  }
 0x1e3   :  { %1528 = vmatprep.subr.bf16.mxu0 %v2808_v3  ;;  %v2854_v3 = vld [vmem:[#allocation11 + $0x80] ss:$8 sps:$4 sm:$0xff]   ;;  %1795 = vmatprep.subr.bf16.mxu1 %v2856_v2 }
 0x1e6   :  { %1529 = vmatpush1.bf16.msra.mxu0 %v2806_v4  ;;  %1796 = vmatpush1.bf16.msra.mxu1 %v2854_v3  ;;  %v2859_v4 = vld [vmem:[#allocation11 + $0x94] ss:$8 sps:$4 sm:$0xff]  }
 0x1e7   :  { %1530 = vmatprep.subr.bf16.mxu0 %v2811_v5  ;;  %v2857_v5 = vld [vmem:[#allocation11 + $0x90] ss:$8 sps:$4 sm:$0xff]   ;;  %1797 = vmatprep.subr.bf16.mxu1 %v2859_v4 }
 0x1ea   :  { %1531 = vmatpush1.bf16.msra.mxu0 %v2809_v6  ;;  %1798 = vmatpush1.bf16.msra.mxu1 %v2857_v5  ;;  %v2862_v6 = vld [vmem:[#allocation11 + $0xa4] ss:$8 sps:$4 sm:$0xff]  }
 0x1eb   :  { %1532 = vmatprep.subr.bf16.mxu0 %v2814_v7  ;;  %v2860_v7 = vld [vmem:[#allocation11 + $0xa0] ss:$8 sps:$4 sm:$0xff]   ;;  %1799 = vmatprep.subr.bf16.mxu1 %v2862_v6 }
 0x1ee   :  { %1533 = vmatpush1.bf16.msra.mxu0 %v2812_v8  ;;  %1800 = vmatpush1.bf16.msra.mxu1 %v2860_v7  ;;  %v2863_v8 = vld [vmem:[#allocation11 + $0xb0] ss:$8 sps:$4 sm:$0xff]  }
 0x1ef   :  { %1534 = vmatprep.subr.bf16.mxu0 %v2817_v10  ;;  %v2868_v10 = vld [vmem:[#allocation11 + $0xc4] ss:$8 sps:$4 sm:$0xff]  }
 0x1f2   :  { %1535 = vmatpush1.bf16.msra.mxu0 %v2815_v9  ;;  %v2865_v9 = vld [vmem:[#allocation11 + $0xb4] ss:$8 sps:$4 sm:$0xff]  }
 0x1f3   :  { %1536 = vmatprep.subr.bf16.mxu0 %v2820_v11  ;;  %1801 = vmatprep.subr.bf16.mxu1 %v2865_v9  ;;  %v2866_v11 = vld [vmem:[#allocation11 + $0xc0] ss:$8 sps:$4 sm:$0xff]  }
 0x1f4   :  { %1802 = vmatpush1.bf16.msra.mxu1 %v2863_v8 }
 0x1f5   :  { %1803 = vmatprep.subr.bf16.mxu1 %v2868_v10 }
 0x1f6   :  { %1537 = vmatpush1.bf16.msra.mxu0 %v2818_v12  ;;  %v2871_v12 = vld [vmem:[#allocation11 + $0xd4] ss:$8 sps:$4 sm:$0xff]  }
 0x1f7   :  { %1538 = vmatprep.subr.bf16.mxu0 %v2823_v13  ;;  %v2869_v13 = vld [vmem:[#allocation11 + $0xd0] ss:$8 sps:$4 sm:$0xff]  }
 0x1f8   :  { %1804 = vmatpush1.bf16.msra.mxu1 %v2866_v11 }
 0x1f9   :  { %1805 = vmatprep.subr.bf16.mxu1 %v2871_v12 }
 0x1fa   :  { %1539 = vmatpush1.bf16.msra.mxu0 %v2821_v14  ;;  %v2874_v14 = vld [vmem:[#allocation11 + $0xe4] ss:$8 sps:$4 sm:$0xff]  }
 0x1fb   :  { %1540 = vmatprep.subr.bf16.mxu0 %v2826_v19  ;;  %v2872_v19 = vld [vmem:[#allocation11 + $0xe0] ss:$8 sps:$4 sm:$0xff]  }
 0x1fc   :  { %1806 = vmatpush1.bf16.msra.mxu1 %v2869_v13 }
 0x1fd   :  { %1807 = vmatprep.subr.bf16.mxu1 %v2874_v14 }
 0x1fe   :  { %1541 = vmatpush1.bf16.msra.mxu0 %v2824_v20  ;;  %v2877_v20 = vld [vmem:[#allocation11 + $0xf4] ss:$8 sps:$4 sm:$0xff]  }
 0x1ff   :  { %1542 = vmatprep.subr.bf16.mxu0 %v2829_v21  ;;  %v2875_v21 = vld [vmem:[#allocation11 + $0xf0] ss:$8 sps:$4 sm:$0xff]  }
 0x200   :  { %1808 = vmatpush1.bf16.msra.mxu1 %v2872_v19  ;;  %v2887_v19 = vld [vmem:[#allocation14 + $0x8] sm:$0xff]  }
 0x201   :  { %1809 = vmatprep.subr.bf16.mxu1 %v2877_v20  ;;  %v2888_v20 = vld [vmem:[#allocation14 + $0x10] sm:$0xff]  }
 0x202   :  { %1543 = vmatpush1.bf16.msra.mxu0 %v2827_v22  ;;  %v3119_v22 = vmov 0.0  }
 0x203   :  { %2483 = vmatprep.subr.bf16.mxu0 %v3119_v22 }
 0x204   :  { %1810 = vmatpush1.bf16.msra.mxu1 %v2875_v21  ;;  %v2889_v21 = vld [vmem:[#allocation14 + $0x18] sm:$0xff]  }
 0x205   :  { %2503 = vmatprep.subr.bf16.mxu1 %v3119_v22 }
 0x298   :  { %v1281_v45 = vpop.f32.mrb[8].mxu1 }
 0x299   :  { %v2547_v46 = vadd.f32 %v1281_v45, %v475_v43  ;;  %v1283_v47 = vpop.f32.mrb[9].mxu1 }
 0x29a   :  { %v2548_v48 = vadd.f32 %v1283_v47, %v479_v44  ;;  %v1285_v17 = vpop.f32.mrb[10].mxu1 }
 0x29b   :  { %v1290_v49 = vmul.f32 0.044715, %v2547_v46  ;;  %v1286_v50 = vpop.f32.mrb[11].mxu1  ;;  %v1288_v58 = vmul.f32 0.5, %v2547_v46 }
 0x29c   :  { %v1291_v51 = vmul.f32 0.044715, %v2548_v48  ;;  %v1289_v60 = vmul.f32 0.5, %v2548_v48 }
 0x29d   :  { %v1292_v39 = vmul.f32 %v2547_v46, %v1290_v49 }
 0x29e   :  { %v1293_v52 = vmul.f32 %v2548_v48, %v1291_v51 }
 0x29f   :  { %v1294_v53 = vmul.f32 %v2547_v46, %v1292_v39 }
 0x2a0   :  { %v1295_v54 = vmul.f32 %v2548_v48, %v1293_v52 }
 0x2a1   :  { %v1296_v55 = vadd.f32 %v2547_v46, %v1294_v53 }
 0x2a2   :  { %v1297_v56 = vadd.f32 %v2548_v48, %v1295_v54 }
 0x2a3   :  { %v1298_v57 = vmul.f32 0.7978846, %v1296_v55 }
 0x2a4   :  { %v1299_v32 = vmul.f32 0.7978846, %v1297_v56 }
 0x2a5   :  { %2902 = vtanh.f32 %v1298_v57  ;;  %v2878_v57 = vld [vmem:[%s3488_s9] sm:$0xff]  }
 0x2a6   :  { %2904 = vtanh.f32 %v1299_v32  ;;  %v2879_v32 = vld [vmem:[%s3488_s9 + $0x8] sm:$0xff]  }
 0x2af   :  { %v2903_v15 = vpop.eup %2902 }
 0x2b0   :  { %v2905_v26 = vpop.eup %2904  ;;  %v1302_v59 = vadd.f32 1.0, %v2903_v15  ;;  %v2880_v15 = vld [vmem:[%s3488_s9 + $0x10] sm:$0xff]  }
 0x2b1   :  { %v1303_v61 = vadd.f32 1.0, %v2905_v26  ;;  %v2881_v26 = vld [vmem:[%s3488_s9 + $0x18] sm:$0xff]  }
 0x2b2   :  { %v1304_v62 = vmul.f32 %v1302_v59, %v1288_v58  ;;  %v2882_v58 = vld [vmem:[%s3488_s9 + $0x20] sm:$0xff]   ;;  %v2883_v59 = vld [vmem:[%s3488_s9 + $0x28] sm:$0xff]  }
 0x2b3   :  { %v1305_v63 = vmul.f32 %v1303_v61, %v1289_v60  ;;  %v2884_v60 = vld [vmem:[%s3488_s9 + $0x30] sm:$0xff]   ;;  %v2885_v61 = vld [vmem:[%s3488_s9 + $0x38] sm:$0xff]  }
 0x2b4   :  { %v1306_v1 = vpack.c.bf16 %v1304_v62, %v1304_v62  ;;  %v1607_v62 = vld [vmem:[#allocation13] sm:$0x3] }
 0x2b5   :  { %v1307_v0 = vpack.c.bf16 %v1305_v63, %v1305_v63  ;;  %v1616_v63 = vrot.slane %v1607_v62, %v3350_v18  ;;  %v2886_v18 = vld [vmem:[#allocation14] sm:$0xff]  }
 0x2b7   :  { %1544 = vmatprep.mubr.bf16.mxu0 %v1307_v0 }
 0x2b8   :  { %1545 = vmatmul.mubr.bf16.vlgmr.msra.gmra.mrb[0].mxu0 %v1306_v1 }
 0x2b9   :  { %2484 = vmatpush3.bf16.msra.mxu0 %v2878_v57  ;;  %2499 = vmatprep.mubr.msk.bf16.mxu0 %vm3120_vm5, %v3119_v22 }
 0x2ba   :  { %2485 = vmatprep.subr.bf16.mxu0 %v3119_v22 }
 0x2bd   :  { %2486 = vmatpush3.bf16.msra.mxu0 %v2879_v32 }
 0x2be   :  { %2487 = vmatprep.subr.bf16.mxu0 %v3119_v22 }
 0x2c1   :  { %2488 = vmatpush3.bf16.msra.mxu0 %v2880_v15 }
 0x2c2   :  { %2489 = vmatprep.subr.bf16.mxu0 %v3119_v22 }
 0x2c5   :  { %2490 = vmatpush3.bf16.msra.mxu0 %v2881_v26 }
 0x2c6   :  { %2491 = vmatprep.subr.bf16.mxu0 %v3119_v22 }
 0x2c9   :  { %2492 = vmatpush3.bf16.msra.mxu0 %v2882_v58 }
 0x2ca   :  { %2493 = vmatprep.subr.bf16.mxu0 %v3119_v22 }
 0x2cd   :  { %2494 = vmatpush3.bf16.msra.mxu0 %v2883_v59 }
 0x2ce   :  { %2495 = vmatprep.subr.bf16.mxu0 %v3119_v22 }
 0x2d1   :  { %2496 = vmatpush3.bf16.msra.mxu0 %v2884_v60 }
 0x2d2   :  { %2497 = vmatprep.subr.bf16.mxu0 %v3119_v22 }
 0x2d5   :  { %2498 = vmatpush3.bf16.msra.mxu0 %v2885_v61 }
 0x2d6   :  { %2523 = vmatprep.subr.bf16.mxu0 %v3119_v22 }
 0x38b   :  { %v1546_v31 = vpop.f32.mrb[0].mxu0 }
 0x38c   :  { %v2544_v33 = vadd.f32 %v2543_v29, %v1546_v31  ;;  %v1548_v34 = vpop.f32.mrb[1].mxu0  ;;  %v1612_v29 = vrot.slane %v1607_v62, %v3345_v16 }
 0x38d   :  { %v2546_v35 = vadd.f32 %v2545_v30, %v1548_v34  ;;  %v1550_v36 = vpop.f32.mrb[2].mxu0  ;;  %v2427_v30 = vld [vmem:[%s3489_s10] ss:$0 sm:$0xff] }
 0x38e   :  { %v1557_v37 = vmul.f32 0.044715, %v2544_v33  ;;  %v1551_v38 = vpop.f32.mrb[3].mxu0  ;;  %v1555_v50 = vmul.f32 0.5, %v2544_v33 }
 0x38f   :  { %v1558_v40 = vmul.f32 0.044715, %v2546_v35  ;;  %v1556_v39 = vmul.f32 0.5, %v2546_v35 }
 0x390   :  { %v1559_v41 = vmul.f32 %v2544_v33, %v1557_v37 }
 0x391   :  { %v1560_v43 = vmul.f32 %v2546_v35, %v1558_v40 }
 0x392   :  { %v1561_v44 = vmul.f32 %v2544_v33, %v1559_v41 }
 0x393   :  { %v1562_v45 = vmul.f32 %v2546_v35, %v1560_v43 }
 0x394   :  { %v1563_v46 = vadd.f32 %v2544_v33, %v1561_v44 }
 0x395   :  { %v1564_v47 = vadd.f32 %v2546_v35, %v1562_v45 }
 0x396   :  { %v1565_v48 = vmul.f32 0.7978846, %v1563_v46 }
 0x397   :  { %v1566_v42 = vmul.f32 0.7978846, %v1564_v47 }
 0x398   :  { %2906 = vtanh.f32 %v1565_v48 }
 0x399   :  { %2908 = vtanh.f32 %v1566_v42 }
 0x3a2   :  { %v2907_v17 = vpop.eup %2906 }
 0x3a3   :  { %v2909_v49 = vpop.eup %2908  ;;  %v1569_v51 = vadd.f32 1.0, %v2907_v17  ;;  %v2895_v17 = vld [vmem:[%s3492_s13 + $0x8] sm:$0xff]  }
 0x3a4   :  { %v1570_v52 = vadd.f32 1.0, %v2909_v49  ;;  %v2896_v49 = vld [vmem:[%s3492_s13 + $0x10] sm:$0xff]  }
 0x3a5   :  { %v1571_v53 = vmul.f32 %v1569_v51, %v1555_v50  ;;  %v2897_v50 = vld [vmem:[%s3492_s13 + $0x18] sm:$0xff]   ;;  %v2898_v51 = vld [vmem:[%s3492_s13 + $0x20] sm:$0xff]  }
 0x3a6   :  { %v1572_v54 = vmul.f32 %v1570_v52, %v1556_v39  ;;  %v2899_v39 = vld [vmem:[%s3492_s13 + $0x28] sm:$0xff]   ;;  %v2900_v52 = vld [vmem:[%s3492_s13 + $0x30] sm:$0xff]  }
 0x3a7   :  { %v1573_v56 = vpack.c.bf16 %v1571_v53, %v1571_v53  ;;  %v2901_v53 = vld [vmem:[%s3492_s13 + $0x38] sm:$0xff]  }
 0x3a8   :  { %v1574_v55 = vpack.c.bf16 %v1572_v54, %v1572_v54  ;;  %v2436_v54 = vld [vmem:[%s3491_s12] ss:$0 sm:$0xff] }
 0x3aa   :  { %1811 = vmatprep.mubr.bf16.mxu1 %v1574_v55 }
 0x3ab   :  { %1812 = vmatmul.mubr.bf16.vlgmr.msra.gmra.mrb[12].mxu1 %v1573_v56 }
 0x3ac   :  { %2519 = vmatprep.mubr.msk.bf16.mxu1 %vm3120_vm5, %v3119_v22  ;;  %2504 = vmatpush3.bf16.msra.mxu1 %v2886_v18 }
 0x3ad   :  { %2505 = vmatprep.subr.bf16.mxu1 %v3119_v22 }
 0x3b0   :  { %2506 = vmatpush3.bf16.msra.mxu1 %v2887_v19 }
 0x3b1   :  { %2507 = vmatprep.subr.bf16.mxu1 %v3119_v22 }
 0x3b4   :  { %2508 = vmatpush3.bf16.msra.mxu1 %v2888_v20  ;;  %v2454_v20 = vld [vmem:[%s3494_s15] ss:$0 sm:$0xff] }
 0x3b5   :  { %2509 = vmatprep.subr.bf16.mxu1 %v3119_v22 }
 0x3b8   :  { %2510 = vmatpush3.bf16.msra.mxu1 %v2889_v21 }
 0x3b9   :  { %2511 = vmatprep.subr.bf16.mxu1 %v3119_v22 }
 0x3bc   :  { %2512 = vmatpush3.bf16.msra.mxu1 %v2890_v23 }
 0x3bd   :  { %2513 = vmatprep.subr.bf16.mxu1 %v3119_v22 }
 0x3c0   :  { %2514 = vmatpush3.bf16.msra.mxu1 %v2891_v24 }
 0x3c1   :  { %2515 = vmatprep.subr.bf16.mxu1 %v3119_v22 }
 0x3c4   :  { %2516 = vmatpush3.bf16.msra.mxu1 %v2892_v25  ;;  %v2455_v25 = vld [vmem:[#allocation2] ss:$0 sm:$0xff] }
 0x3c5   :  { %2517 = vmatprep.subr.bf16.mxu1 %v3119_v22 }
 0x3c8   :  { %2518 = vmatpush3.bf16.msra.mxu1 %v2893_v27 }
 0x47e   :  { %v1813_v0 = vpop.f32.mrb[12].mxu1 }
 0x47f   :  { %v1815_v1 = vpop.f32.mrb[13].mxu1  ;;  %v1814_v33 = vadd.f32 %v1813_v0, %v1612_v29 }
 0x480   :  { %v1816_v2 = vadd.f32 %v1815_v1, %v1616_v63  ;;  %v1817_v3 = vpop.f32.mrb[14].mxu1 }
 0x481   :  { %v1818_v4 = vpop.f32.mrb[15].mxu1 }
 0x482   :  { %v1821_v5 = vmul.f32 0.044715, %v1816_v2  ;;  %v1820_v11 = vmul.f32 0.5, %v1816_v2 }
 0x484   :  { %v1822_v6 = vmul.f32 %v1821_v5, %v1816_v2 }
 0x486   :  { %v1823_v7 = vmul.f32 %v1822_v6, %v1816_v2 }
 0x488   :  { %v1824_v8 = vadd.f32 %v1823_v7, %v1816_v2  ;;  %v2445_v2 = vld [vmem:[%s3493_s14] ss:$0 sm:$0xff] }
 0x48a   :  { %v1825_v9 = vmul.f32 0.7978846, %v1824_v8 }
 0x48c   :  { %2910 = vtanh.f32 %v1825_v9 }
 0x496   :  { %v2911_v10 = vpop.eup %2910 }
 0x497   :  { %v1827_v12 = vadd.f32 1.0, %v2911_v10 }
 0x499   :  { %v1828_v13 = vmul.f32 %v1827_v12, %v1820_v11 }
 0x49b   :  { %v1829_v14 = vpack.c.bf16 %v1828_v13, %v1828_v13 }
 0x49d   :  { %2500 = vmatmul.mubr.bf16.vlgmr.msra.gmra.mrb[4].mxu0 %v1829_v14 }
 0x49e   :  { %2539 = vmatprep.mubr.msk.bf16.mxu0 %vm3120_vm5, %v3119_v22  ;;  %2524 = vmatpush3.bf16.msra.mxu0 %v2894_v28 }
 0x49f   :  { %2525 = vmatprep.subr.bf16.mxu0 %v3119_v22 }
 0x4a2   :  { %2526 = vmatpush3.bf16.msra.mxu0 %v2895_v17 }
 0x4a3   :  { %2527 = vmatprep.subr.bf16.mxu0 %v3119_v22 }
 0x4a6   :  { %2528 = vmatpush3.bf16.msra.mxu0 %v2896_v49 }
 0x4a7   :  { %2529 = vmatprep.subr.bf16.mxu0 %v3119_v22 }
 0x4aa   :  { %2530 = vmatpush3.bf16.msra.mxu0 %v2897_v50 }
 0x4ab   :  { %2531 = vmatprep.subr.bf16.mxu0 %v3119_v22 }
 0x4ae   :  { %2532 = vmatpush3.bf16.msra.mxu0 %v2898_v51 }
 0x4af   :  { %2533 = vmatprep.subr.bf16.mxu0 %v3119_v22 }
 0x4b2   :  { %2534 = vmatpush3.bf16.msra.mxu0 %v2899_v39 }
 0x4b3   :  { %2535 = vmatprep.subr.bf16.mxu0 %v3119_v22 }
 0x4b6   :  { %2536 = vmatpush3.bf16.msra.mxu0 %v2900_v52 }
 0x4b7   :  { %2537 = vmatprep.subr.bf16.mxu0 %v3119_v22 }
 0x4ba   :  { %2538 = vmatpush3.bf16.msra.mxu0 %v2901_v53 }
 0x570   :  { %v1935_v31 = vpop.f32.mrb[4].mxu0 }
 0x571   :  { %v1936_v34 = vadd.f32 %v2427_v30, %v1935_v31  ;;  %v2501_v35 = vpop.f32.mrb[5].mxu0 }
 0x572   :  { %v1938_v36 = vpop.f32.mrb[6].mxu0 }
 0x573   :  { %v1941_v37 = vadd.f32 %v1936_v34, %v1814_v33  ;;  %v2502_v38 = vpop.f32.mrb[7].mxu0 }
 0x575   :  { %v1943_v40 = vmul.f32 0.044715, %v1941_v37  ;;  %v1942_v47 = vmul.f32 0.5, %v1941_v37 }
 0x577   :  { %v1944_v41 = vmul.f32 %v1943_v40, %v1941_v37 }
 0x579   :  { %v1945_v43 = vmul.f32 %v1944_v41, %v1941_v37 }
 0x57b   :  { %v1946_v44 = vadd.f32 %v1945_v43, %v1941_v37 }
 0x57d   :  { %v1947_v45 = vmul.f32 0.7978846, %v1946_v44 }
 0x57f   :  { %2912 = vtanh.f32 %v1947_v45 }
 0x589   :  { %v2913_v46 = vpop.eup %2912 }
 0x58a   :  { %v1949_v16 = vadd.f32 1.0, %v2913_v46 }
 0x58c   :  { %v1950_v48 = vmul.f32 %v1949_v16, %v1942_v47 }
 0x58e   :  { %v1951_v42 = vpack.c.bf16 %v1950_v48, %v1950_v48 }
 0x590   :  { %2520 = vmatmul.mubr.bf16.vlgmr.msra.gmra.mrb[16].mxu1 %v1951_v42 }
 0x663   :  { %v2057_v55 = vpop.f32.mrb[16].mxu1 }
 0x664   :  { %v2058_v56 = vadd.f32 %v2436_v54, %v2057_v55  ;;  %v2521_v57 = vpop.f32.mrb[17].mxu1 }
 0x665   :  { %v2060_v32 = vpop.f32.mrb[18].mxu1 }
 0x666   :  { %v2064_v15 = vmul.f32 0.044715, %v2058_v56  ;;  %v2522_v26 = vpop.f32.mrb[19].mxu1  ;;  %v2063_v63 = vmul.f32 0.5, %v2058_v56 }
 0x668   :  { %v2065_v58 = vmul.f32 %v2064_v15, %v2058_v56 }
 0x66a   :  { %v2066_v59 = vmul.f32 %v2065_v58, %v2058_v56 }
 0x66c   :  { %v2067_v60 = vadd.f32 %v2066_v59, %v2058_v56 }
 0x66e   :  { %v2068_v61 = vmul.f32 0.7978846, %v2067_v60 }
 0x670   :  { %2914 = vtanh.f32 %v2068_v61 }
 0x67a   :  { %v2915_v62 = vpop.eup %2914 }
 0x67b   :  { %v2070_v0 = vadd.f32 1.0, %v2915_v62 }
 0x67d   :  { %v2071_v22 = vmul.f32 %v2070_v0, %v2063_v63 }
 0x67f   :  { %v2072_v1 = vpack.c.bf16 %v2071_v22, %v2071_v22 }
 0x681   :  { %2540 = vmatmul.mubr.bf16.vlgmr.msra.gmra.mrb[8].mxu0 %v2072_v1 }
 0x754   :  { %v2178_v3 = vpop.f32.mrb[8].mxu0 }
 0x755   :  { %v2179_v4 = vadd.f32 %v2445_v2, %v2178_v3  ;;  %v2541_v5 = vpop.f32.mrb[9].mxu0 }
 0x756   :  { %v2181_v6 = vpop.f32.mrb[10].mxu0 }
 0x757   :  { %v2184_v7 = vadd.f32 %v2179_v4, %v2058_v56  ;;  %v2542_v8 = vpop.f32.mrb[11].mxu0 }
 0x759   :  { %v2186_v9 = vmul.f32 0.044715, %v2184_v7  ;;  %v2185_v18 = vmul.f32 0.5, %v2184_v7 }
 0x75b   :  { %v2187_v10 = vmul.f32 %v2186_v9, %v2184_v7 }
 0x75d   :  { %v2188_v11 = vmul.f32 %v2187_v10, %v2184_v7 }
 0x75f   :  { %v2189_v12 = vadd.f32 %v2188_v11, %v2184_v7 }
 0x761   :  { %v2190_v13 = vmul.f32 0.7978846, %v2189_v12 }
 0x763   :  { %2916 = vtanh.f32 %v2190_v13 }
 0x76d   :  { %v2917_v14 = vpop.eup %2916 }
 0x76e   :  { %v2192_v19 = vadd.f32 1.0, %v2917_v14 }
 0x770   :  { %v2193_v21 = vmul.f32 %v2192_v19, %v2185_v18 }
 0x772   :  { %v2201_v23 = vmul.f32 %v2454_v20, %v2193_v21 }
 0x774   :  { %v2203_v24 = vsel %vm2202_vm6, %v2201_v23, 0.0 }
 0x775   :  { %2204 = vadd.xlane.f32.xlu0 %v2203_v24 }
 0x802   :  { %v2205_v27 = vpop.xlane.xlu0 %2204 }
 0x803   :  { %v2213_v28 = vadd.f32 %v2455_v25, %v2205_v27 }
 0x805   :  { %2215 = vst.msk [vmem:[%s3496_s17] sm:$0xff] %vm2214_vm7, %v2213_v28 }
 0x806   :  { %2220 = vsyncpa [#allocation4], 1 }
 0x807   :  { %2221 = vsyncpa [#allocation6], 1 }
 0x808   :  { %2222 = vsyncpa [#allocation9], 1 }
 0x809   :  { %2223 = vsyncpa [#allocation12], 1 }
 0x80a   :  { %2224 = vsyncpa [#allocation15], 1 }

</bundles_post_ra>
